<compile_context>
chip_gen: v7x
topology: tpu7x:2x2x1
jax: 0.10.0
libtpu: 0.0.40
codegen_flags: <defaults>
</compile_context>

<pallas_src>
import functools
import math

import jax
import jax.numpy as jnp
from jax.experimental import pallas as pl
from jax.experimental.pallas import tpu as pltpu

# f32 operands are matmul'd at HIGHEST precision (matches the f32 PyTorch/XLA reference);
# bf16 operands are fed to the MXU natively (no f32 upcast of operands).
_PREC = jax.lax.Precision.HIGHEST


def _mha_kernel(*refs, nhead, dh, has_mask):
    if has_mask:
        (q_ref, k_ref, v_ref,
         wq_ref, wk_ref, wv_ref,
         bq_ref, bk_ref, bv_ref,
         wo_ref, bo_ref, mask_ref,
         o_ref, kp_scr, vp_scr) = refs
    else:
        (q_ref, k_ref, v_ref,
         wq_ref, wk_ref, wv_ref,
         bq_ref, bk_ref, bv_ref,
         wo_ref, bo_ref,
         o_ref, kp_scr, vp_scr) = refs
        mask_ref = None

    qi = pl.program_id(1)

    # --- Hoisted K/V in-projection: one full-width (Lk, D) @ (D, D) matmul each, done
    # once per batch element and reused across every Lq tile and every head.
    @pl.when(qi == 0)
    def _():
        k = k_ref[0]                                               # (Lk, D), native dtype
        v = v_ref[0]
        kp = jnp.dot(k, wk_ref[...], precision=_PREC,
                     preferred_element_type=jnp.float32) + bk_ref[...]
        vp = jnp.dot(v, wv_ref[...], precision=_PREC,
                     preferred_element_type=jnp.float32) + bv_ref[...]
        kp_scr[...] = kp.astype(kp_scr.dtype)
        vp_scr[...] = vp.astype(vp_scr.dtype)

    # --- Q in-projection for this Lq tile (1/sqrt(dh) already folded into wq / bq).
    q = q_ref[0]                                                   # (tq, D)
    qp = (jnp.dot(q, wq_ref[...], precision=_PREC,
                  preferred_element_type=jnp.float32) + bq_ref[...]).astype(q_ref.dtype)
    kp = kp_scr[...]                                               # (Lk, D)
    vp = vp_scr[...]

    mask = mask_ref[...].astype(jnp.float32) if has_mask else None

    # --- Per-head scaled dot-product attention (nhead is a small static int -> unrolled).
    ctx_heads = []
    for h in range(nhead):
        sl = slice(h * dh, (h + 1) * dh)
        qh, kh, vh = qp[:, sl], kp[:, sl], vp[:, sl]
        s = jax.lax.dot_general(qh, kh, (((1,), (1,)), ((), ())), precision=_PREC,
                                preferred_element_type=jnp.float32)        # (tq, Lk)
        if mask is not None:
            s = s + mask
        m = jnp.max(s, axis=-1, keepdims=True)
        p = jnp.exp(s - m)
        l = jnp.sum(p, axis=-1, keepdims=True)
        ctx = jnp.dot(p.astype(vh.dtype), vh, precision=_PREC,
                      preferred_element_type=jnp.float32)                  # (tq, dh)
        # One reciprocal per row instead of an (Lq, Lk) elementwise divide.
        ctx_heads.append(ctx * pl.reciprocal(l, approx=False))
    ctx = ctx_heads[0] if nhead == 1 else jnp.concatenate(ctx_heads, axis=-1)
    ctx = ctx.astype(q_ref.dtype)                                          # (tq, D)

    # --- Single deep-K output projection: (tq, D) @ (D, D).
    out = jnp.dot(ctx, wo_ref[...], precision=_PREC,
                  preferred_element_type=jnp.float32) + bo_ref[...]
    o_ref[0] = out.astype(o_ref.dtype)


def multi_head_attention(query, key, value,
                         in_proj_weight, in_proj_bias,
                         out_proj_weight, out_proj_bias,
                         nhead, attn_mask=None):
    """Matches nn.MultiheadAttention(d_model, nhead, batch_first=True) forward."""
    B, Lq, D = query.shape
    Lk = key.shape[1]
    assert value.shape[:2] == (B, Lk) and key.shape[-1] == D and value.shape[-1] == D
    assert D % nhead == 0
    dh = D // nhead
    scale = 1.0 / math.sqrt(dh)

    # PyTorch convention y = x @ W.T + b -> orient for in-kernel `x @ W`.
    # The softmax scale is folded into wq / bq (free at run time).
    wq = in_proj_weight[:D].T * scale
    wk = in_proj_weight[D:2 * D].T
    wv = in_proj_weight[2 * D:3 * D].T
    bq = (in_proj_bias[:D] * scale).reshape(1, D)
    bk = in_proj_bias[D:2 * D].reshape(1, D)
    bv = in_proj_bias[2 * D:3 * D].reshape(1, D)
    wo = out_proj_weight.T
    bo = out_proj_bias.reshape(1, D)

    # Lq tiling: full sequence for short inputs, bounded tiles for long ones.
    tq = Lq
    if Lq > 256:
        for cand in (256, 128, 64, 32, 16, 8):
            if Lq % cand == 0:
                tq = cand
                break
    nq = Lq // tq

    has_mask = attn_mask is not None
    inputs = [query, key, value, wq, wk, wv, bq, bk, bv, wo, bo]
    in_specs = [
        pl.BlockSpec((1, tq, D), lambda b, qi: (b, qi, 0)),
        pl.BlockSpec((1, Lk, D), lambda b, qi: (b, 0, 0)),   # resident across Lq tiles
        pl.BlockSpec((1, Lk, D), lambda b, qi: (b, 0, 0)),
        pl.BlockSpec((D, D), lambda b, qi: (0, 0)),          # weights resident
        pl.BlockSpec((D, D), lambda b, qi: (0, 0)),
        pl.BlockSpec((D, D), lambda b, qi: (0, 0)),
        pl.BlockSpec((1, D), lambda b, qi: (0, 0)),
        pl.BlockSpec((1, D), lambda b, qi: (0, 0)),
        pl.BlockSpec((1, D), lambda b, qi: (0, 0)),
        pl.BlockSpec((D, D), lambda b, qi: (0, 0)),
        pl.BlockSpec((1, D), lambda b, qi: (0, 0)),
    ]
    if has_mask:
        # TODO(synk): only a 2-D (Lq, Lk) attn_mask is supported (no 3-D per-head mask,
        # no key_padding_mask).  Bool mask: True == masked out (PyTorch semantics).
        if attn_mask.dtype == jnp.bool_:
            mask = jnp.where(attn_mask, jnp.float32(-1e9), jnp.float32(0.0))
        else:
            mask = attn_mask.astype(jnp.float32)
        assert mask.shape == (Lq, Lk)
        inputs.append(mask)
        in_specs.append(pl.BlockSpec((tq, Lk), lambda b, qi: (qi, 0)))

    itemsize = jnp.dtype(query.dtype).itemsize
    w_itemsize = jnp.dtype(in_proj_weight.dtype).itemsize

    # VMEM budget (clamped to 64 MiB so the request is valid on v7x's smaller VMEM).
    est = ((2 * tq * D + 4 * Lk * D + 2 * tq * D) * itemsize      # q/k/v/out (double-buffered)
           + (4 * D * D + 4 * D) * w_itemsize                     # resident weights/biases
           + 2 * Lk * D * itemsize                                # kp/vp scratch
           + (2 * tq * Lk * 4 if has_mask else 0))
    vmem_limit = int(min(64 * 1024 * 1024, max(32 * 1024 * 1024, 2 * est)))

    flops = (2 * B * D * D * (Lq + 2 * Lk)        # q/k/v in-projections
             + 4 * B * Lq * Lk * D                # scores + p@v (all heads)
             + 2 * B * Lq * D * D)                # output projection
    transcendentals = B * nhead * Lq * Lk
    bytes_accessed = (itemsize * B * (2 * Lq * D + 2 * Lk * D)
                      + w_itemsize * (4 * D * D + 4 * D)
                      + (4 * Lq * Lk if has_mask else 0))

    kernel = functools.partial(_mha_kernel, nhead=nhead, dh=dh, has_mask=has_mask)

    # TODO(synk): if B can be 1 on v7x, the Lq axis could be promoted to "parallel"
    # (recomputing K/V projections per tile) to keep both TensorCores busy.
    out = pl.pallas_call(
        kernel,
        out_shape=jax.ShapeDtypeStruct((B, Lq, D), query.dtype),
        grid_spec=pltpu.PrefetchScalarGridSpec(
            num_scalar_prefetch=0,
            grid=(B, nq),
            in_specs=in_specs,
            out_specs=pl.BlockSpec((1, tq, D), lambda b, qi: (b, qi, 0)),
            scratch_shapes=[pltpu.VMEM((Lk, D), query.dtype),   # projected K
                            pltpu.VMEM((Lk, D), query.dtype)],  # projected V
        ),
        compiler_params=pltpu.CompilerParams(
            dimension_semantics=("parallel", "arbitrary"),
            vmem_limit_bytes=vmem_limit,
        ),
        cost_estimate=pl.CostEstimate(
            flops=flops, transcendentals=transcendentals, bytes_accessed=bytes_accessed),
    )(*inputs)
    return out


def ref_multi_head_attention(query, key, value, in_proj_w, in_proj_b,
                             out_proj_w, out_proj_b, nhead, attn_mask=None):
    """Pure-JAX reference matching torch.nn.MultiheadAttention forward (batch_first)."""
    B, Lq, D = query.shape
    Lk = key.shape[1]
    dh = D // nhead
    prec = jax.lax.Precision.HIGHEST
    wq, wk, wv = in_proj_w[:D], in_proj_w[D:2 * D], in_proj_w[2 * D:3 * D]
    bq, bk, bv = in_proj_b[:D], in_proj_b[D:2 * D], in_proj_b[2 * D:3 * D]
    q = jnp.einsum("bld,ed->ble", query, wq, precision=prec) + bq
    k = jnp.einsum("bld,ed->ble", key, wk, precision=prec) + bk
    v = jnp.einsum("bld,ed->ble", value, wv, precision=prec) + bv
    q = q.reshape(B, Lq, nhead, dh).transpose(0, 2, 1, 3)
    k = k.reshape(B, Lk, nhead, dh).transpose(0, 2, 1, 3)
    v = v.reshape(B, Lk, nhead, dh).transpose(0, 2, 1, 3)
    s = jnp.einsum("bhqd,bhkd->bhqk", q, k, precision=prec) / math.sqrt(dh)
    if attn_mask is not None:
        s = s + attn_mask
    p = jax.nn.softmax(s, axis=-1)
    ctx = jnp.einsum("bhqk,bhkd->bhqd", p, v, precision=prec)
    ctx = ctx.transpose(0, 2, 1, 3).reshape(B, Lq, D)
    return jnp.einsum("bld,ed->ble", ctx, out_proj_w, precision=prec) + out_proj_b


if __name__ == "__main__":
    d_model, nhead = 64, 4
    batch, seq = 2, 8

    root = jax.random.PRNGKey(0)
    kq, kk, kv, kw1, kb1, kw2, kb2 = jax.random.split(root, 7)

    query = jax.random.normal(kq, (batch, seq, d_model), jnp.float32)
    key_in = jax.random.normal(kk, (batch, seq, d_model), jnp.float32)
    value = jax.random.normal(kv, (batch, seq, d_model), jnp.float32)

    bound = 1.0 / math.sqrt(d_model)
    in_proj_weight = jax.random.uniform(kw1, (3 * d_model, d_model), jnp.float32, -bound, bound)
    in_proj_bias = jax.random.uniform(kb1, (3 * d_model,), jnp.float32, -bound, bound)
    out_proj_weight = jax.random.uniform(kw2, (d_model, d_model), jnp.float32, -bound, bound)
    out_proj_bias = jax.random.uniform(kb2, (d_model,), jnp.float32, -bound, bound)

    mha = jax.jit(multi_head_attention, static_argnames=("nhead",))

    # --- No-mask path.
    out = jax.block_until_ready(mha(query, key_in, value, in_proj_weight, in_proj_bias,
                                    out_proj_weight, out_proj_bias, nhead=nhead))
    ref = ref_multi_head_attention(query, key_in, value, in_proj_weight, in_proj_bias,
                                   out_proj_weight, out_proj_bias, nhead)
    assert out.shape == (batch, seq, d_model)
    err = float(jnp.max(jnp.abs(out - ref)))
    assert jnp.allclose(out, ref, atol=1e-3, rtol=1e-3), f"no-mask mismatch, max abs err={err}"

    # --- Causal bool-mask path (True == masked, PyTorch semantics).
    causal = jnp.triu(jnp.ones((seq, seq), jnp.bool_), k=1)
    out_m = jax.block_until_ready(mha(query, key_in, value, in_proj_weight, in_proj_bias,
                                      out_proj_weight, out_proj_bias, nhead=nhead,
                                      attn_mask=causal))
    ref_m = ref_multi_head_attention(query, key_in, value, in_proj_weight, in_proj_bias,
                                     out_proj_weight, out_proj_bias, nhead,
                                     attn_mask=jnp.where(causal, -jnp.inf, 0.0))
    err_m = float(jnp.max(jnp.abs(out_m - ref_m)))
    assert jnp.allclose(out_m, ref_m, atol=1e-3, rtol=1e-3), f"mask mismatch, max abs err={err_m}"

    print("KERNEL_OK")
</pallas_src>

<mosaic_0001>
module attributes {stable_mosaic.version = 11 : i64} {
  func.func @_mha_kernel(%arg0: i32, %arg1: i32, %arg2: memref<1x8x64xf32, #tpu.memory_space<vmem>>, %arg3: memref<1x8x64xf32, #tpu.memory_space<vmem>>, %arg4: memref<1x8x64xf32, #tpu.memory_space<vmem>>, %arg5: memref<64x64xf32, #tpu.memory_space<vmem>>, %arg6: memref<64x64xf32, #tpu.memory_space<vmem>>, %arg7: memref<64x64xf32, #tpu.memory_space<vmem>>, %arg8: memref<1x64xf32, #tpu.memory_space<vmem>>, %arg9: memref<1x64xf32, #tpu.memory_space<vmem>>, %arg10: memref<1x64xf32, #tpu.memory_space<vmem>>, %arg11: memref<64x64xf32, #tpu.memory_space<vmem>>, %arg12: memref<1x64xf32, #tpu.memory_space<vmem>>, %arg13: memref<1x8x64xf32, #tpu.memory_space<vmem>>, %arg14: memref<8x64xf32, #tpu.memory_space<vmem>>, %arg15: memref<8x64xf32, #tpu.memory_space<vmem>>) attributes {dimension_semantics = [#tpu.dimension_semantics<parallel>, #tpu.dimension_semantics<arbitrary>], iteration_bounds = array<i64: 2, 1>, scalar_prefetch = 0 : i64, scratch_operands = 2 : i64, tpu.core_type = #tpu.core_type<tc>, window_params = [{transform_indices = @transform_0, window_bounds = array<i64: 1, 8, 64>}, {transform_indices = @transform_1, window_bounds = array<i64: 1, 8, 64>}, {transform_indices = @transform_2, window_bounds = array<i64: 1, 8, 64>}, {pipeline_mode = #tpu.pipeline_mode<synchronous>, transform_indices = @transform_3, window_bounds = array<i64: 64, 64>}, {pipeline_mode = #tpu.pipeline_mode<synchronous>, transform_indices = @transform_4, window_bounds = array<i64: 64, 64>}, {pipeline_mode = #tpu.pipeline_mode<synchronous>, transform_indices = @transform_5, window_bounds = array<i64: 64, 64>}, {pipeline_mode = #tpu.pipeline_mode<synchronous>, transform_indices = @transform_6, window_bounds = array<i64: 1, 64>}, {pipeline_mode = #tpu.pipeline_mode<synchronous>, transform_indices = @transform_7, window_bounds = array<i64: 1, 64>}, {pipeline_mode = #tpu.pipeline_mode<synchronous>, transform_indices = @transform_8, window_bounds = array<i64: 1, 64>}, {pipeline_mode = #tpu.pipeline_mode<synchronous>, transform_indices = @transform_9, window_bounds = array<i64: 64, 64>}, {pipeline_mode = #tpu.pipeline_mode<synchronous>, transform_indices = @transform_10, window_bounds = array<i64: 1, 64>}, {transform_indices = @transform_11, window_bounds = array<i64: 1, 8, 64>}]} {
    %c0_i32 = arith.constant 0 : i32
    %0 = arith.cmpi eq, %arg1, %c0_i32 : i32
    %1 = arith.extui %0 : i1 to i32
    %c0_i32_0 = arith.constant 0 : i32
    %2 = arith.cmpi ne, %1, %c0_i32_0 : i32
    scf.if %2 {
      %c0_35 = arith.constant 0 : index
      %c0_36 = arith.constant 0 : index
      %c0_37 = arith.constant 0 : index
      %81 = vector.load %arg3[%c0_35, %c0_36, %c0_37] : memref<1x8x64xf32, #tpu.memory_space<vmem>>, vector<1x8x64xf32>
      %82 = vector.shape_cast %81 : vector<1x8x64xf32> to vector<8x64xf32>
      %c0_38 = arith.constant 0 : index
      %c0_39 = arith.constant 0 : index
      %c0_40 = arith.constant 0 : index
      %83 = vector.load %arg4[%c0_38, %c0_39, %c0_40] : memref<1x8x64xf32, #tpu.memory_space<vmem>>, vector<1x8x64xf32>
      %84 = vector.shape_cast %83 : vector<1x8x64xf32> to vector<8x64xf32>
      %c0_41 = arith.constant 0 : index
      %c0_42 = arith.constant 0 : index
      %85 = vector.load %arg6[%c0_41, %c0_42] : memref<64x64xf32, #tpu.memory_space<vmem>>, vector<64x64xf32>
      %cst_43 = arith.constant dense<0.000000e+00> : vector<8x64xf32>
      %86 = tpu.matmul %82, %85, %cst_43 {dimension_numbers = #tpu.dot_dimension_numbers<[1], [0], [0], [1], [0, 0, 1, 1], [], []>, precision = #tpu.contract_precision<fp32>} : vector<8x64xf32>, vector<64x64xf32>, vector<8x64xf32> -> vector<8x64xf32>
      %c0_44 = arith.constant 0 : index
      %c0_45 = arith.constant 0 : index
      %87 = vector.load %arg9[%c0_44, %c0_45] : memref<1x64xf32, #tpu.memory_space<vmem>>, vector<1x64xf32>
      %88 = vector.broadcast %87 : vector<1x64xf32> to vector<8x64xf32>
      %89 = arith.addf %86, %88 : vector<8x64xf32>
      %c0_46 = arith.constant 0 : index
      %c0_47 = arith.constant 0 : index
      %90 = vector.load %arg7[%c0_46, %c0_47] : memref<64x64xf32, #tpu.memory_space<vmem>>, vector<64x64xf32>
      %cst_48 = arith.constant dense<0.000000e+00> : vector<8x64xf32>
      %91 = tpu.matmul %84, %90, %cst_48 {dimension_numbers = #tpu.dot_dimension_numbers<[1], [0], [0], [1], [0, 0, 1, 1], [], []>, precision = #tpu.contract_precision<fp32>} : vector<8x64xf32>, vector<64x64xf32>, vector<8x64xf32> -> vector<8x64xf32>
      %c0_49 = arith.constant 0 : index
      %c0_50 = arith.constant 0 : index
      %92 = vector.load %arg10[%c0_49, %c0_50] : memref<1x64xf32, #tpu.memory_space<vmem>>, vector<1x64xf32>
      %93 = vector.broadcast %92 : vector<1x64xf32> to vector<8x64xf32>
      %94 = arith.addf %91, %93 : vector<8x64xf32>
      %c0_51 = arith.constant 0 : index
      %c0_52 = arith.constant 0 : index
      %95 = vector.load %arg14[%c0_51, %c0_52] : memref<8x64xf32, #tpu.memory_space<vmem>>, vector<8x64xf32>
      tpu.vector_store %arg14[%c0_51, %c0_52], %89 {strides = array<i32>} : memref<8x64xf32, #tpu.memory_space<vmem>>, vector<8x64xf32>,
      %c0_53 = arith.constant 0 : index
      %c0_54 = arith.constant 0 : index
      %96 = vector.load %arg15[%c0_53, %c0_54] : memref<8x64xf32, #tpu.memory_space<vmem>>, vector<8x64xf32>
      tpu.vector_store %arg15[%c0_53, %c0_54], %94 {strides = array<i32>} : memref<8x64xf32, #tpu.memory_space<vmem>>, vector<8x64xf32>,
    } else {
    }
    %c0 = arith.constant 0 : index
    %c0_1 = arith.constant 0 : index
    %c0_2 = arith.constant 0 : index
    %3 = vector.load %arg2[%c0, %c0_1, %c0_2] : memref<1x8x64xf32, #tpu.memory_space<vmem>>, vector<1x8x64xf32>
    %4 = vector.shape_cast %3 : vector<1x8x64xf32> to vector<8x64xf32>
    %c0_3 = arith.constant 0 : index
    %c0_4 = arith.constant 0 : index
    %5 = vector.load %arg5[%c0_3, %c0_4] : memref<64x64xf32, #tpu.memory_space<vmem>>, vector<64x64xf32>
    %cst = arith.constant dense<0.000000e+00> : vector<8x64xf32>
    %6 = tpu.matmul %4, %5, %cst {dimension_numbers = #tpu.dot_dimension_numbers<[1], [0], [0], [1], [0, 0, 1, 1], [], []>, precision = #tpu.contract_precision<fp32>} : vector<8x64xf32>, vector<64x64xf32>, vector<8x64xf32> -> vector<8x64xf32>
    %c0_5 = arith.constant 0 : index
    %c0_6 = arith.constant 0 : index
    %7 = vector.load %arg8[%c0_5, %c0_6] : memref<1x64xf32, #tpu.memory_space<vmem>>, vector<1x64xf32>
    %8 = vector.broadcast %7 : vector<1x64xf32> to vector<8x64xf32>
    %9 = arith.addf %6, %8 : vector<8x64xf32>
    %c0_7 = arith.constant 0 : index
    %c0_8 = arith.constant 0 : index
    %10 = vector.load %arg14[%c0_7, %c0_8] : memref<8x64xf32, #tpu.memory_space<vmem>>, vector<8x64xf32>
    %c0_9 = arith.constant 0 : index
    %c0_10 = arith.constant 0 : index
    %11 = vector.load %arg15[%c0_9, %c0_10] : memref<8x64xf32, #tpu.memory_space<vmem>>, vector<8x64xf32>
    %12 = vector.extract_strided_slice %9 {offsets = [0, 0], sizes = [8, 16], strides = [1, 1]} : vector<8x64xf32> to vector<8x16xf32>
    %13 = vector.extract_strided_slice %10 {offsets = [0, 0], sizes = [8, 16], strides = [1, 1]} : vector<8x64xf32> to vector<8x16xf32>
    %14 = vector.extract_strided_slice %11 {offsets = [0, 0], sizes = [8, 16], strides = [1, 1]} : vector<8x64xf32> to vector<8x16xf32>
    %cst_11 = arith.constant dense<0.000000e+00> : vector<8x8xf32>
    %15 = tpu.matmul %12, %13, %cst_11 {dimension_numbers = #tpu.dot_dimension_numbers<[1], [1], [0], [0], [0, 0, 1, 0], [], []>, precision = #tpu.contract_precision<fp32>} : vector<8x16xf32>, vector<8x16xf32>, vector<8x8xf32> -> vector<8x8xf32>
    %cst_12 = arith.constant dense<0xFF800000> : vector<8xf32>
    %16 = vector.multi_reduction <maximumf>, %15, %cst_12 [1] : vector<8x8xf32> to vector<8xf32>
    %17 = vector.shape_cast %16 : vector<8xf32> to vector<8x1xf32>
    %18 = vector.broadcast %17 : vector<8x1xf32> to vector<8x8xf32>
    %19 = arith.subf %15, %18 : vector<8x8xf32>
    %20 = math.exp %19 : vector<8x8xf32>
    %cst_13 = arith.constant dense<0.000000e+00> : vector<8xf32>
    %21 = vector.multi_reduction <add>, %20, %cst_13 [1] : vector<8x8xf32> to vector<8xf32>
    %22 = vector.shape_cast %21 : vector<8xf32> to vector<8x1xf32>
    %cst_14 = arith.constant dense<0.000000e+00> : vector<8x16xf32>
    %23 = tpu.matmul %20, %14, %cst_14 {dimension_numbers = #tpu.dot_dimension_numbers<[1], [0], [0], [1], [0, 0, 1, 1], [], []>, precision = #tpu.contract_precision<fp32>} : vector<8x8xf32>, vector<8x16xf32>, vector<8x16xf32> -> vector<8x16xf32>
    %24 = tpu.reciprocal %22 : vector<8x1xf32> -> vector<8x1xf32>
    %25 = vector.broadcast %24 : vector<8x1xf32> to vector<8x16xf32>
    %26 = arith.mulf %23, %25 : vector<8x16xf32>
    %27 = vector.extract_strided_slice %9 {offsets = [0, 16], sizes = [8, 16], strides = [1, 1]} : vector<8x64xf32> to vector<8x16xf32>
    %28 = vector.extract_strided_slice %10 {offsets = [0, 16], sizes = [8, 16], strides = [1, 1]} : vector<8x64xf32> to vector<8x16xf32>
    %29 = vector.extract_strided_slice %11 {offsets = [0, 16], sizes = [8, 16], strides = [1, 1]} : vector<8x64xf32> to vector<8x16xf32>
    %cst_15 = arith.constant dense<0.000000e+00> : vector<8x8xf32>
    %30 = tpu.matmul %27, %28, %cst_15 {dimension_numbers = #tpu.dot_dimension_numbers<[1], [1], [0], [0], [0, 0, 1, 0], [], []>, precision = #tpu.contract_precision<fp32>} : vector<8x16xf32>, vector<8x16xf32>, vector<8x8xf32> -> vector<8x8xf32>
    %cst_16 = arith.constant dense<0xFF800000> : vector<8xf32>
    %31 = vector.multi_reduction <maximumf>, %30, %cst_16 [1] : vector<8x8xf32> to vector<8xf32>
    %32 = vector.shape_cast %31 : vector<8xf32> to vector<8x1xf32>
    %33 = vector.broadcast %32 : vector<8x1xf32> to vector<8x8xf32>
    %34 = arith.subf %30, %33 : vector<8x8xf32>
    %35 = math.exp %34 : vector<8x8xf32>
    %cst_17 = arith.constant dense<0.000000e+00> : vector<8xf32>
    %36 = vector.multi_reduction <add>, %35, %cst_17 [1] : vector<8x8xf32> to vector<8xf32>
    %37 = vector.shape_cast %36 : vector<8xf32> to vector<8x1xf32>
    %cst_18 = arith.constant dense<0.000000e+00> : vector<8x16xf32>
    %38 = tpu.matmul %35, %29, %cst_18 {dimension_numbers = #tpu.dot_dimension_numbers<[1], [0], [0], [1], [0, 0, 1, 1], [], []>, precision = #tpu.contract_precision<fp32>} : vector<8x8xf32>, vector<8x16xf32>, vector<8x16xf32> -> vector<8x16xf32>
    %39 = tpu.reciprocal %37 : vector<8x1xf32> -> vector<8x1xf32>
    %40 = vector.broadcast %39 : vector<8x1xf32> to vector<8x16xf32>
    %41 = arith.mulf %38, %40 : vector<8x16xf32>
    %42 = vector.extract_strided_slice %9 {offsets = [0, 32], sizes = [8, 16], strides = [1, 1]} : vector<8x64xf32> to vector<8x16xf32>
    %43 = vector.extract_strided_slice %10 {offsets = [0, 32], sizes = [8, 16], strides = [1, 1]} : vector<8x64xf32> to vector<8x16xf32>
    %44 = vector.extract_strided_slice %11 {offsets = [0, 32], sizes = [8, 16], strides = [1, 1]} : vector<8x64xf32> to vector<8x16xf32>
    %cst_19 = arith.constant dense<0.000000e+00> : vector<8x8xf32>
    %45 = tpu.matmul %42, %43, %cst_19 {dimension_numbers = #tpu.dot_dimension_numbers<[1], [1], [0], [0], [0, 0, 1, 0], [], []>, precision = #tpu.contract_precision<fp32>} : vector<8x16xf32>, vector<8x16xf32>, vector<8x8xf32> -> vector<8x8xf32>
    %cst_20 = arith.constant dense<0xFF800000> : vector<8xf32>
    %46 = vector.multi_reduction <maximumf>, %45, %cst_20 [1] : vector<8x8xf32> to vector<8xf32>
    %47 = vector.shape_cast %46 : vector<8xf32> to vector<8x1xf32>
    %48 = vector.broadcast %47 : vector<8x1xf32> to vector<8x8xf32>
    %49 = arith.subf %45, %48 : vector<8x8xf32>
    %50 = math.exp %49 : vector<8x8xf32>
    %cst_21 = arith.constant dense<0.000000e+00> : vector<8xf32>
    %51 = vector.multi_reduction <add>, %50, %cst_21 [1] : vector<8x8xf32> to vector<8xf32>
    %52 = vector.shape_cast %51 : vector<8xf32> to vector<8x1xf32>
    %cst_22 = arith.constant dense<0.000000e+00> : vector<8x16xf32>
    %53 = tpu.matmul %50, %44, %cst_22 {dimension_numbers = #tpu.dot_dimension_numbers<[1], [0], [0], [1], [0, 0, 1, 1], [], []>, precision = #tpu.contract_precision<fp32>} : vector<8x8xf32>, vector<8x16xf32>, vector<8x16xf32> -> vector<8x16xf32>
    %54 = tpu.reciprocal %52 : vector<8x1xf32> -> vector<8x1xf32>
    %55 = vector.broadcast %54 : vector<8x1xf32> to vector<8x16xf32>
    %56 = arith.mulf %53, %55 : vector<8x16xf32>
    %57 = vector.extract_strided_slice %9 {offsets = [0, 48], sizes = [8, 16], strides = [1, 1]} : vector<8x64xf32> to vector<8x16xf32>
    %58 = vector.extract_strided_slice %10 {offsets = [0, 48], sizes = [8, 16], strides = [1, 1]} : vector<8x64xf32> to vector<8x16xf32>
    %59 = vector.extract_strided_slice %11 {offsets = [0, 48], sizes = [8, 16], strides = [1, 1]} : vector<8x64xf32> to vector<8x16xf32>
    %cst_23 = arith.constant dense<0.000000e+00> : vector<8x8xf32>
    %60 = tpu.matmul %57, %58, %cst_23 {dimension_numbers = #tpu.dot_dimension_numbers<[1], [1], [0], [0], [0, 0, 1, 0], [], []>, precision = #tpu.contract_precision<fp32>} : vector<8x16xf32>, vector<8x16xf32>, vector<8x8xf32> -> vector<8x8xf32>
    %cst_24 = arith.constant dense<0xFF800000> : vector<8xf32>
    %61 = vector.multi_reduction <maximumf>, %60, %cst_24 [1] : vector<8x8xf32> to vector<8xf32>
    %62 = vector.shape_cast %61 : vector<8xf32> to vector<8x1xf32>
    %63 = vector.broadcast %62 : vector<8x1xf32> to vector<8x8xf32>
    %64 = arith.subf %60, %63 : vector<8x8xf32>
    %65 = math.exp %64 : vector<8x8xf32>
    %cst_25 = arith.constant dense<0.000000e+00> : vector<8xf32>
    %66 = vector.multi_reduction <add>, %65, %cst_25 [1] : vector<8x8xf32> to vector<8xf32>
    %67 = vector.shape_cast %66 : vector<8xf32> to vector<8x1xf32>
    %cst_26 = arith.constant dense<0.000000e+00> : vector<8x16xf32>
    %68 = tpu.matmul %65, %59, %cst_26 {dimension_numbers = #tpu.dot_dimension_numbers<[1], [0], [0], [1], [0, 0, 1, 1], [], []>, precision = #tpu.contract_precision<fp32>} : vector<8x8xf32>, vector<8x16xf32>, vector<8x16xf32> -> vector<8x16xf32>
    %69 = tpu.reciprocal %67 : vector<8x1xf32> -> vector<8x1xf32>
    %70 = vector.broadcast %69 : vector<8x1xf32> to vector<8x16xf32>
    %71 = arith.mulf %68, %70 : vector<8x16xf32>
    %72 = tpu.concatenate %26, %41, %56, %71 in 1 : vector<8x16xf32>, vector<8x16xf32>, vector<8x16xf32>, vector<8x16xf32> -> vector<8x64xf32>
    %c0_27 = arith.constant 0 : index
    %c0_28 = arith.constant 0 : index
    %73 = vector.load %arg11[%c0_27, %c0_28] : memref<64x64xf32, #tpu.memory_space<vmem>>, vector<64x64xf32>
    %cst_29 = arith.constant dense<0.000000e+00> : vector<8x64xf32>
    %74 = tpu.matmul %72, %73, %cst_29 {dimension_numbers = #tpu.dot_dimension_numbers<[1], [0], [0], [1], [0, 0, 1, 1], [], []>, precision = #tpu.contract_precision<fp32>} : vector<8x64xf32>, vector<64x64xf32>, vector<8x64xf32> -> vector<8x64xf32>
    %c0_30 = arith.constant 0 : index
    %c0_31 = arith.constant 0 : index
    %75 = vector.load %arg12[%c0_30, %c0_31] : memref<1x64xf32, #tpu.memory_space<vmem>>, vector<1x64xf32>
    %76 = vector.broadcast %75 : vector<1x64xf32> to vector<8x64xf32>
    %77 = arith.addf %74, %76 : vector<8x64xf32>
    %c0_32 = arith.constant 0 : index
    %c0_33 = arith.constant 0 : index
    %c0_34 = arith.constant 0 : index
    %78 = vector.load %arg13[%c0_32, %c0_33, %c0_34] : memref<1x8x64xf32, #tpu.memory_space<vmem>>, vector<1x8x64xf32>
    %79 = vector.shape_cast %78 : vector<1x8x64xf32> to vector<8x64xf32>
    %80 = vector.shape_cast %77 : vector<8x64xf32> to vector<1x8x64xf32>
    tpu.vector_store %arg13[%c0_32, %c0_33, %c0_34], %80 {strides = array<i32>} : memref<1x8x64xf32, #tpu.memory_space<vmem>>, vector<1x8x64xf32>,
    return
  }
  func.func @transform_0(%arg0: i32, %arg1: i32) -> (i32, i32, i32) {
    %c0_i32 = arith.constant 0 : i32
    %c0_i32_0 = arith.constant 0 : i32
    return %arg0, %arg1, %c0_i32 : i32, i32, i32
  }
  func.func @transform_1(%arg0: i32, %arg1: i32) -> (i32, i32, i32) {
    %c0_i32 = arith.constant 0 : i32
    %c0_i32_0 = arith.constant 0 : i32
    %c0_i32_1 = arith.constant 0 : i32
    return %arg0, %c0_i32, %c0_i32_0 : i32, i32, i32
  }
  func.func @transform_2(%arg0: i32, %arg1: i32) -> (i32, i32, i32) {
    %c0_i32 = arith.constant 0 : i32
    %c0_i32_0 = arith.constant 0 : i32
    %c0_i32_1 = arith.constant 0 : i32
    return %arg0, %c0_i32, %c0_i32_0 : i32, i32, i32
  }
  func.func @transform_3(%arg0: i32, %arg1: i32) -> (i32, i32) {
    %c0_i32 = arith.constant 0 : i32
    %c0_i32_0 = arith.constant 0 : i32
    %c0_i32_1 = arith.constant 0 : i32
    return %c0_i32, %c0_i32_0 : i32, i32
  }
  func.func @transform_4(%arg0: i32, %arg1: i32) -> (i32, i32) {
    %c0_i32 = arith.constant 0 : i32
    %c0_i32_0 = arith.constant 0 : i32
    %c0_i32_1 = arith.constant 0 : i32
    return %c0_i32, %c0_i32_0 : i32, i32
  }
  func.func @transform_5(%arg0: i32, %arg1: i32) -> (i32, i32) {
    %c0_i32 = arith.constant 0 : i32
    %c0_i32_0 = arith.constant 0 : i32
    %c0_i32_1 = arith.constant 0 : i32
    return %c0_i32, %c0_i32_0 : i32, i32
  }
  func.func @transform_6(%arg0: i32, %arg1: i32) -> (i32, i32) {
    %c0_i32 = arith.constant 0 : i32
    %c0_i32_0 = arith.constant 0 : i32
    %c0_i32_1 = arith.constant 0 : i32
    return %c0_i32, %c0_i32_0 : i32, i32
  }
  func.func @transform_7(%arg0: i32, %arg1: i32) -> (i32, i32) {
    %c0_i32 = arith.constant 0 : i32
    %c0_i32_0 = arith.constant 0 : i32
    %c0_i32_1 = arith.constant 0 : i32
    return %c0_i32, %c0_i32_0 : i32, i32
  }
  func.func @transform_8(%arg0: i32, %arg1: i32) -> (i32, i32) {
    %c0_i32 = arith.constant 0 : i32
    %c0_i32_0 = arith.constant 0 : i32
    %c0_i32_1 = arith.constant 0 : i32
    return %c0_i32, %c0_i32_0 : i32, i32
  }
  func.func @transform_9(%arg0: i32, %arg1: i32) -> (i32, i32) {
    %c0_i32 = arith.constant 0 : i32
    %c0_i32_0 = arith.constant 0 : i32
    %c0_i32_1 = arith.constant 0 : i32
    return %c0_i32, %c0_i32_0 : i32, i32
  }
  func.func @transform_10(%arg0: i32, %arg1: i32) -> (i32, i32) {
    %c0_i32 = arith.constant 0 : i32
    %c0_i32_0 = arith.constant 0 : i32
    %c0_i32_1 = arith.constant 0 : i32
    return %c0_i32, %c0_i32_0 : i32, i32
  }
  func.func @transform_11(%arg0: i32, %arg1: i32) -> (i32, i32, i32) {
    %c0_i32 = arith.constant 0 : i32
    %c0_i32_0 = arith.constant 0 : i32
    return %arg0, %arg1, %c0_i32 : i32, i32, i32
  }
}

</mosaic_0001>

<bundles_post_ra>
// kernel: multi_head_attention.1
= control target key start
LH: loop header
LB: loop body
LE: loop exit
PB: predicated region body
PF: predicated region fallthrough
CT: control target
= control target key end

     0   :  { %s9078_s0 = inlined_call_operand.vmem [shape: f32[2,8,64], index: 0, kind: input, shape index: {}]   ;;  %s9079_s1 = inlined_call_operand.vmem [shape: f32[2,8,64], index: 1, kind: input, shape index: {}]   ;;  %s9080_s2 = inlined_call_operand.vmem [shape: f32[2,8,64], index: 2, kind: input, shape index: {}]   ;;  %s9081_s3 = inlined_call_operand.vmem [shape: f32[64,64], index: 3, kind: input, shape index: {}]   ;;  %s9082_s4 = inlined_call_operand.vmem [shape: f32[64,64], index: 4, kind: input, shape index: {}]   ;;  %s9083_s5 = inlined_call_operand.vmem [shape: f32[64,64], index: 5, kind: input, shape index: {}]   ;;  %s9084_s6 = inlined_call_operand.vmem [shape: f32[1,64], index: 6, kind: input, shape index: {}]   ;;  %s9085_s7 = inlined_call_operand.vmem [shape: f32[1,64], index: 7, kind: input, shape index: {}]   ;;  %s9086_s8 = inlined_call_operand.vmem [shape: f32[1,64], index: 8, kind: input, shape index: {}]   ;;  %s9087_s9 = inlined_call_operand.vmem [shape: f32[64,64], index: 9, kind: input, shape index: {}]   ;;  %s9088_s10 = inlined_call_operand.vmem [shape: f32[1,64], index: 10, kind: input, shape index: {}]   ;;  %s9089_s11 = inlined_call_operand.hbm [shape: f32[2,8,64], index: 11, kind: output, shape index: {}]  }
   0x1   :  { %9093 = sst [smem:[#allocation7_spill]] %s9079_s1 }
   0x2   :  { %9094 = sst [smem:[#allocation8_spill]] %s9082_s4 }
   0x3   :  { %16 = vsyncpa [#allocation5], 0 }
   0x4   :  { %18 = vsyncpa [#allocation5 + $0x1], 0  ;;  %s8134_s17 = smov 0   ;;  %s8136_s18 = smov 0  }
   0x5   :  { %s8138_s19 = smov 0   ;;  %s8140_s20 = smov 0  }
   0x6   :  { %s8142_s21 = smov 0   ;;  %s8144_s22 = smov 0  }
   0x7 LB: > { %s6468_s23 = sadd.s32 4294967295, %s8062_s22   ;;  %s6469_s24 = sadd.s32 4294967294, %s8062_s22   ;;  %s8062_s22 = sphi %s8144_s22, %s24_s22   ;;  %s8058_s21 = sphi %s8142_s21, %s9106_s21   ;;  %s8054_s20 = sphi %s8140_s20, %s9105_s20   ;;  %s8050_s19 = sphi %s8138_s19, %s9104_s19   ;;  %s8046_s18 = sphi %s8136_s18, %s9103_s18   ;;  %s8042_s17 = sphi %s8134_s17, %s9102_s17  }
   0x8   : > { %s36_s25 = sadd.s32 1, %s8058_s21  ;;  %s293_s26 = sadd.s32 1, %s8050_s19 }
   0x9   : > { %p38_p0 = scmp.ge.s32.totalorder %s36_s25, 2  ;;  %p303_p1 = scmp.ne.s32.totalorder %s8050_s19, %s8046_s18 }
   0xa   : > { %p304_p2 = scmp.eq.s32.totalorder %s6468_s23, 1  ;;  %p309_p3 = scmp.ne.s32.totalorder %s8046_s18, %s8042_s17 }
   0xb   : > { %s9108_s25 = smov (%p38_p0, %s36_s25), 0  ;;  %p310_p5 = scmp.eq.s32.totalorder %s6469_s24, 1 }
   0xc   : > { %p8174_p4 = por %p304_p2, %p303_p1  ;;  %s288_s28 = ssub.s32 %s8058_s21, %s9108_s25 }
   0xd   : > { %p6472_p6 = scmp.ge.s32.totalorder %s8062_s22, 1  ;;  %p291_p7 = scmp.eq.s32.totalorder %s288_s28, 0 }
   0xe   : > { %p8181_p8 = por %p310_p5, %p309_p3  ;;  %p376_p9 = scmp.lt.s32.totalorder %s8062_s22, 3 }
   0xf   : > { %s8187_s30 = scalar_select %p291_p7, %s8050_s19, %s293_s26  }
  0x10   : > { %p377_p10 = pnand %p6472_p6, %p376_p9 }
  0x11   : > { %s9097_s4 = sld [smem:[#allocation8_spill]] (!%p377_p10)  ;;  %v8064_v3 = vmov (!%p377_p10), 0.0|0.0   ;;  %vm8065_vm0 = vmmov (!%p377_p10), 0   ;;  %v8066_v11 = vmov (!%p377_p10), 0.0   ;;  %p426_p11 = scmp.lt.s32.totalorder (!%p377_p10), %s8054_s20, 1  ;;  %vm462_vm1 = vcmask (!%p377_p10), 523264  }
  0x12   : > { %380 = sbr.rel (%p377_p10) target bundleno = 2059 (0x80b), region = 64  ;;  %7493 = vmatprep.subr.bf16.mxu1 (!%p377_p10), %v8064_v3  ;;  %7529 = vmatprep.subr.bf16.mxu0 (!%p377_p10), %v8064_v3  ;;  %s9098_s1 = sld [smem:[#allocation7_spill]] (!%p377_p10)  ;;  %vm2119_vm2 = vcmask (!%p377_p10), 130048   ;;  %vm2572_vm3 = vcmask (!%p377_p10), 64512   ;;  %vm5798_vm4 = vcmask (!%p377_p10), 261120   ;;  %vm5800_vm5 = vcmask (!%p377_p10), 392192  }
  0x13   : > { %6813 = vmatprep.mubr.msk.f32.mxu1 (!%p377_p10), %vm8065_vm0, %v8066_v11  ;;  %6870 = vmatprep.mubr.msk.f32.mxu0 (!%p377_p10), %vm8065_vm0, %v8066_v11  ;;  %s8068_s16 = smov (!%p377_p10), 96   ;;  %s8070_s12 = smov (!%p377_p10), 16  }
  0x14   : > { %s6482_s13 = sshll.u32 (!%p377_p10), %s8054_s20, 7 }
  0x15   : > { %s9030_s15 = scalar_lea.hbm (!%p377_p10), %s9089_s11, %s6482_s13 }
  0x17   : > { %v447_v0 = vld [vmem:[%s9097_s4] sm:$0xff] (!%p377_p10)  ;;  %v448_v1 = vld [vmem:[%s9097_s4 + $0x8] sm:$0xff] (!%p377_p10)  ;;  %v449_v2 = vld [vmem:[%s9097_s4 + $0x10] sm:$0xff] (!%p377_p10) }
  0x18   : > { %v467_v4 = vand.u32 (!%p377_p10), 4294901760, %v447_v0  ;;  %v470_v5 = vand.u32 (!%p377_p10), 4294901760, %v448_v1  ;;  %v450_v6 = vld [vmem:[%s9097_s4 + $0x18] sm:$0xff] (!%p377_p10)  ;;  %v473_v7 = vand.u32 (!%p377_p10), 4294901760, %v449_v2  ;;  %v451_v8 = vld [vmem:[%s9097_s4 + $0x20] sm:$0xff] (!%p377_p10)  ;;  %v452_v9 = vld [vmem:[%s9097_s4 + $0x28] sm:$0xff] (!%p377_p10) }
  0x19   : > { %v476_v10 = vand.u32 4294901760, %v450_v6  ;;  %v479_v17 = vand.u32 4294901760, %v451_v8  ;;  %v482_v18 = vand.u32 4294901760, %v452_v9  ;;  %v453_v19 = vld [vmem:[%s9097_s4 + $0x30] sm:$0xff]  ;;  %v454_v20 = vld [vmem:[%s9097_s4 + $0x38] sm:$0xff]  ;;  %s427_s26 = scalar_select %p426_p11, %s8054_s20, 1 }
  0x1a   : > { %v8214_v12 = vpack.c.bf16 %v470_v5, %v467_v4  ;;  %v8216_v13 = vsub.f32 %v447_v0, %v467_v4  ;;  %v8218_v14 = vsub.f32 %v448_v1, %v470_v5  ;;  %v8220_v15 = vsub.f32 %v449_v2, %v473_v7  ;;  %s8073_s20 = smov [#allocation4]  }
  0x1b   : > { %v8222_v16 = vsub.f32 %v450_v6, %v476_v10  ;;  %v8233_v21 = vpack.c.bf16 %v476_v10, %v473_v7  ;;  %s8237_s28 = sshll.u32 %s427_s26, 3  ;;  %v485_v24 = vand.u32 4294901760, %v453_v19  ;;  %v488_v25 = vand.u32 4294901760, %v454_v20  ;;  %s8069_s26 = smov 80  }
  0x1c   : > { %7495 = vmatpush3.bf16.msra.mxu1 %v8214_v12  ;;  %7531 = vmatpush3.bf16.msra.mxu0 %v8214_v12  ;;  %v552_v22 = vand.u32 4294901760, %v8216_v13  ;;  %v559_v23 = vand.u32 4294901760, %v8218_v14  ;;  %s436_s14 = scalar_lea.vmem %s9098_s1, %s8237_s28  ;;  %v8245_v26 = vpack.c.bf16 %v482_v18, %v479_v17  ;;  %v8247_v27 = vsub.f32 %v451_v8, %v479_v17  ;;  %s432_s23 = scalar_lea.vmem %s9078_s0, %s8237_s28  ;;  %v1561_v8 = vld [vmem:[%s9081_s3] sm:$0xff] }
  0x1d   : > { %7496 = vmatprep.subr.bf16.mxu1 %v8064_v3  ;;  %7532 = vmatprep.subr.bf16.mxu0 %v8064_v3  ;;  %v445_v28 = vld [vmem:[%s436_s14] sm:$0xff]  ;;  %v566_v29 = vand.u32 4294901760, %v8220_v15  ;;  %v573_v30 = vand.u32 4294901760, %v8222_v16  ;;  %v8253_v31 = vsub.f32 %v452_v9, %v482_v18  ;;  %v8262_v36 = vpack.c.bf16 %v488_v25, %v485_v24  ;;  %v1562_v9 = vld [vmem:[%s9081_s3 + $0x8] sm:$0xff]  ;;  %s440_s4 = scalar_lea.vmem %s9080_s2, %s8237_s28  ;;  %s8071_s14 = smov 32  }
  0x1e   : > { %v464_v32 = vsel %vm462_vm1, %v445_v28, 0  ;;  %v553_v33 = vsub.f32 %v8216_v13, %v552_v22  ;;  %v560_v34 = vsub.f32 %v8218_v14, %v559_v23  ;;  %v8264_v37 = vsub.f32 %v453_v19, %v485_v24  ;;  %v1003_v17 = vld [vmem:[%s9083_s5] sm:$0xff]  ;;  %v1004_v18 = vld [vmem:[%s9083_s5 + $0x8] sm:$0xff] }
  0x1f   : > { %v8260_v35 = vand.u32 4294901760, %v464_v32  ;;  %v567_v39 = vsub.f32 %v8220_v15, %v566_v29  ;;  %v574_v40 = vsub.f32 %v8222_v16, %v573_v30  ;;  %v580_v41 = vand.u32 4294901760, %v8247_v27  ;;  %v446_v19 = vld [vmem:[%s440_s4] sm:$0xff]  ;;  %v1566_v24 = vld [vmem:[%s9081_s3 + $0x28] sm:$0xff]  ;;  %s423_s4 = sand.u32 1, %s8046_s18  }
  0x20   : > { %7498 = vmatpush3.bf16.msra.mxu1 %v8233_v21  ;;  %7534 = vmatpush3.bf16.msra.mxu0 %v8233_v21  ;;  %v8274_v42 = vsub.f32 %v454_v20, %v488_v25  ;;  %v554_v43 = vand.u32 4294901760, %v553_v33  ;;  %v561_v44 = vand.u32 4294901760, %v560_v34  ;;  %v587_v45 = vand.u32 4294901760, %v8253_v31  ;;  %v1006_v33 = vld [vmem:[%s9083_s5 + $0x18] sm:$0xff]  ;;  %s6473_s24 = sshll.u32 %s423_s4, 3 }
  0x21   : > { %7499 = vmatprep.subr.bf16.mxu1 %v8064_v3  ;;  %7535 = vmatprep.subr.bf16.mxu0 %v8064_v3  ;;  %v8267_v38 = vsub.f32 %v464_v32, %v8260_v35  ;;  %v7542_v47 = vpack.c.bf16 %v559_v23, %v552_v22  ;;  %v568_v49 = vand.u32 4294901760, %v567_v39  ;;  %v575_v50 = vand.u32 4294901760, %v574_v40  ;;  %v1565_v23 = vld [vmem:[%s9081_s3 + $0x20] sm:$0xff]  ;;  %v1005_v32 = vld [vmem:[%s9083_s5 + $0x10] sm:$0xff]  ;;  %s425_s1 = scalar_lea.vmem [#allocation4], %s6473_s24  ;;  %s7988_s24 = sshll.u32 %s8073_s20, 4  ;;  %s7989_s24 = int_to_ptr.vmem [resolvable:$false] %s7988_s24 }
  0x22   : > { %v581_v51 = vsub.f32 %v8247_v27, %v580_v41  ;;  %v7506_v52 = vpack.c.bf16 %v561_v44, %v554_v43  ;;  %v588_v53 = vsub.f32 %v8253_v31, %v587_v45  ;;  %v594_v54 = vand.u32 4294901760, %v8264_v37  ;;  %s6373_s28 = sshll.u32 %s425_s1, 4  ;;  %s9032_s28 = int_to_ptr.vmem [resolvable:$true] %s6373_s28 }
  0x23   : > { %v541_v46 = vand.u32 4294901760, %v8267_v38  ;;  %v601_v55 = vand.u32 4294901760, %v8274_v42  ;;  %v7545_v57 = vpack.c.bf16 %v573_v30, %v566_v29  ;;  %v7509_v59 = vpack.c.bf16 %v575_v50, %v568_v49  ;;  %v1007_v49 = vld [vmem:[%s9083_s5 + $0x20] sm:$0xff]  ;;  %p7991_p1 = scmp.lt.s32.totalorder %s9032_s28, %s7989_s24 }
  0x24   : > { %7501 = vmatpush3.bf16.msra.mxu1 %v8245_v26  ;;  %7537 = vmatpush3.bf16.msra.mxu0 %v8245_v26  ;;  %v582_v58 = vand.u32 4294901760, %v581_v51  ;;  %v589_v60 = vand.u32 4294901760, %v588_v53  ;;  %v595_v61 = vsub.f32 %v8264_v37, %v594_v54  ;;  %v7548_v0 = vpack.c.bf16 %v587_v45, %v580_v41 }
  0x25   : > { %7502 = vmatprep.subr.bf16.mxu1 %v8064_v3  ;;  %7538 = vmatprep.subr.bf16.mxu0 %v8064_v3  ;;  %v542_v48 = vsub.f32 %v8267_v38, %v541_v46  ;;  %v602_v62 = vsub.f32 %v8274_v42, %v601_v55  ;;  %v7551_v5 = vpack.c.bf16 %v601_v55, %v594_v54  ;;  %v1022_v28 = vand.u32 4294901760, %v1003_v17  ;;  %v1008_v54 = vld [vmem:[%s9083_s5 + $0x28] sm:$0xff] }
  0x26   : > { %v7512_v63 = vpack.c.bf16 %v589_v60, %v582_v58  ;;  %v596_v1 = vand.u32 4294901760, %v595_v61  ;;  %v7518_v6 = vpack.c.bf16 %v8218_v14, %v8216_v13  ;;  %v7521_v7 = vpack.c.bf16 %v8222_v16, %v8220_v15  ;;  %v1564_v13 = vld [vmem:[%s9081_s3 + $0x18] sm:$0xff]  ;;  %v1560_v14 = vld [vmem:[%s432_s23] sm:$0xff]  ;;  %s8067_s23 = smov 112  }
  0x27   : > { %v543_v56 = vand.u32 4294901760, %v542_v48  ;;  %v603_v2 = vand.u32 4294901760, %v602_v62  ;;  %v7524_v10 = vpack.c.bf16 %v8253_v31, %v8247_v27  ;;  %v1581_v15 = vand.u32 4294901760, %v1561_v8  ;;  %v1568_v27 = vld [vmem:[%s9081_s3 + $0x38] sm:$0xff] }
  0x28   : > { %7504 = vmatpush3.bf16.msra.mxu1 %v8262_v36  ;;  %7540 = vmatpush3.bf16.msra.mxu0 %v8262_v36  ;;  %v1584_v16 = vand.u32 4294901760, %v1562_v9  ;;  %v7527_v20 = vpack.c.bf16 %v8274_v42, %v8264_v37  ;;  %v1590_v22 = vand.u32 4294901760, %v1564_v13  ;;  %v1578_v25 = vsel %vm462_vm1, %v1560_v14, 0 }
  0x29   : > { %7505 = vmatprep.subr.bf16.mxu1 %v8064_v3  ;;  %7541 = vmatprep.subr.bf16.mxu0 %v8064_v3  ;;  %v7515_v4 = vpack.c.bf16 %v603_v2, %v596_v1  ;;  %v1025_v29 = vand.u32 4294901760, %v1004_v18  ;;  %v8367_v31 = vsub.f32 %v1561_v8, %v1581_v15  ;;  %v1019_v34 = vsel %vm462_vm1, %v446_v19, 0  ;;  %v1010_v1 = vld [vmem:[%s9083_s5 + $0x38] sm:$0xff] }
  0x2a   : > { %v8365_v30 = vpack.c.bf16 %v1584_v16, %v1581_v15  ;;  %v8376_v37 = vsub.f32 %v1562_v9, %v1584_v16  ;;  %v1593_v39 = vand.u32 4294901760, %v1565_v23  ;;  %v1596_v40 = vand.u32 4294901760, %v1566_v24 }
  0x2b   : > { %6814 = vmatmul.mubr.f32.vlgmr.msra.gmra.mrb[0].mxu1 %v543_v56  ;;  %6871 = vmatmul.mubr.f32.vlgmr.msra.gmra.mrb[0].mxu0 %v541_v46  ;;  %v8378_v41 = vand.u32 4294901760, %v1578_v25  ;;  %v1602_v45 = vand.u32 4294901760, %v1568_v27  ;;  %v8387_v46 = vpack.c.bf16 %v1025_v29, %v1022_v28  ;;  %v1031_v48 = vand.u32 4294901760, %v1006_v33 }
  0x2c   : > { %7507 = vmatpush3.bf16.msra.mxu1 %v7506_v52  ;;  %7543 = vmatpush3.bf16.msra.mxu0 %v7542_v47  ;;  %v1028_v47 = vand.u32 4294901760, %v1005_v32  ;;  %v8392_v50 = vand.u32 4294901760, %v1019_v34  ;;  %v8396_v51 = vsub.f32 %v1565_v23, %v1593_v39  ;;  %v8398_v52 = vsub.f32 %v1003_v17, %v1022_v28 }
  0x2d   : > { %7508 = vmatprep.subr.bf16.mxu1 %v8064_v3  ;;  %7544 = vmatprep.subr.bf16.mxu0 %v8064_v3  ;;  %v8400_v53 = vsub.f32 %v1004_v18, %v1025_v29  ;;  %v8407_v55 = vpack.c.bf16 %v1596_v40, %v1593_v39  ;;  %v8410_v56 = vsub.f32 %v1578_v25, %v8378_v41  ;;  %v1673_v58 = vand.u32 4294901760, %v8376_v37 }
  0x2e   : > { %6832 = vmatprep.mubr.msk.f32.mxu1 %vm8065_vm0, %v8066_v11  ;;  %6889 = vmatprep.mubr.msk.f32.mxu0 %vm8065_vm0, %v8066_v11  ;;  %v8424_v61 = vpack.c.bf16 %v1031_v48, %v1028_v47  ;;  %v8426_v62 = vsub.f32 %v1005_v32, %v1028_v47  ;;  %v8435_v2 = vsub.f32 %v1019_v34, %v8392_v50  ;;  %v1043_v16 = vand.u32 4294901760, %v1010_v1 }
  0x2f   : > { %v8446_v8 = vsub.f32 %v1568_v27, %v1602_v45  ;;  %v1655_v9 = vand.u32 4294901760, %v8410_v56  ;;  %v9092_v27 = vand.u32 4294901760, %v8396_v51 }
  0x30   : > { %7510 = vmatpush3.bf16.msra.mxu1 %v7509_v59  ;;  %7546 = vmatpush3.bf16.msra.mxu0 %v7545_v57  ;;  %v1666_v57 = vand.u32 4294901760, %v8367_v31  ;;  %v8415_v59 = vsub.f32 %v1566_v24, %v1596_v40  ;;  %v1096_v19 = vand.u32 4294901760, %v8435_v2  ;;  %v8493_v39 = vsub.f32 %v1010_v1, %v1043_v16 }
  0x31   : > { %7511 = vmatprep.subr.bf16.mxu1 %v8064_v3  ;;  %7547 = vmatprep.subr.bf16.mxu0 %v8064_v3  ;;  %v1656_v25 = vsub.f32 %v8410_v56, %v1655_v9 }
  0x32   : > { %v9090_v28 = vand.u32 4294901760, %v8415_v59  ;;  %v1097_v40 = vsub.f32 %v8435_v2, %v1096_v19 }
  0x34   : > { %7513 = vmatpush3.bf16.msra.mxu1 %v7512_v63  ;;  %7549 = vmatpush3.bf16.msra.mxu0 %v7548_v0  ;;  %v1037_v63 = vand.u32 4294901760, %v1008_v54  ;;  %v1009_v0 = vld [vmem:[%s9083_s5 + $0x30] sm:$0xff] }
  0x35   : > { %7514 = vmatprep.subr.bf16.mxu1 %v8064_v3  ;;  %7550 = vmatprep.subr.bf16.mxu0 %v8064_v3  ;;  %v1040_v15 = vand.u32 4294901760, %v1009_v0 }
  0x37   : > { %v8489_v34 = vsub.f32 %v1009_v0, %v1040_v15  ;;  %v1695_v0 = vsub.f32 %v8396_v51, %v9092_v27 }
  0x38   : > { %7516 = vmatpush3.bf16.msra.mxu1 %v7515_v4  ;;  %7552 = vmatpush3.bf16.msra.mxu0 %v7551_v5  ;;  %v8440_v5 = vsub.f32 %v1006_v33, %v1031_v48  ;;  %v8487_v33 = vpack.c.bf16 %v1043_v16, %v1040_v15  ;;  %v1702_v15 = vsub.f32 %v8415_v59, %v9090_v28  ;;  %v1715_v16 = vand.u32 4294901760, %v8446_v8 }
  0x39   : > { %7517 = vmatprep.subr.bf16.mxu1 %v8064_v3  ;;  %7553 = vmatprep.subr.bf16.mxu0 %v8064_v3  ;;  %v1156_v28 = vand.u32 4294901760, %v8493_v39 }
  0x3a   : > { %v1128_v24 = vand.u32 4294901760, %v8440_v5  ;;  %v1703_v27 = vand.u32 4294901760, %v1702_v15 }
  0x3b   : > { %6833 = vmatmul.mubr.f32.vlgmr.msra.gmra.mrb[0].mxu1 %v8260_v35  ;;  %6890 = vmatmul.mubr.f32.vlgmr.msra.gmra.mrb[0].mxu0 %v8260_v35 }
  0x3c   : > { %7519 = vmatpush3.bf16.msra.mxu1 %v7518_v6  ;;  %7555 = vmatpush3.bf16.msra.mxu0 %v8214_v12  ;;  %v1563_v12 = vld [vmem:[%s9081_s3 + $0x10] sm:$0xff]  ;;  %v1107_v6 = vand.u32 4294901760, %v8398_v52 }
  0x3d   : > { %7520 = vmatprep.subr.bf16.mxu1 %v8064_v3  ;;  %7556 = vmatprep.subr.bf16.mxu0 %v8064_v3 }
  0x3e   : > { %6851 = vmatprep.mubr.msk.f32.mxu1 %vm8065_vm0, %v8066_v11  ;;  %6908 = vmatprep.mubr.msk.f32.mxu0 %vm8065_vm0, %v8066_v11 }
  0x40   : > { %7522 = vmatpush3.bf16.msra.mxu1 %v7521_v7  ;;  %7558 = vmatpush3.bf16.msra.mxu0 %v8233_v21  ;;  %v1587_v21 = vand.u32 4294901760, %v1563_v12  ;;  %v1114_v7 = vand.u32 4294901760, %v8400_v53 }
  0x41   : > { %7523 = vmatprep.subr.bf16.mxu1 %v8064_v3  ;;  %7559 = vmatprep.subr.bf16.mxu0 %v8064_v3 }
  0x42   : > { %v8381_v42 = vpack.c.bf16 %v1590_v22, %v1587_v21  ;;  %v8383_v43 = vsub.f32 %v1563_v12, %v1587_v21  ;;  %v8469_v21 = vsub.f32 %v1008_v54, %v1037_v63  ;;  %v1115_v23 = vsub.f32 %v8400_v53, %v1114_v7 }
  0x44   : > { %7525 = vmatpush3.bf16.msra.mxu1 %v7524_v10  ;;  %7561 = vmatpush3.bf16.msra.mxu0 %v8245_v26  ;;  %v1567_v26 = vld [vmem:[%s9081_s3 + $0x30] sm:$0xff]  ;;  %v1667_v10 = vsub.f32 %v8367_v31, %v1666_v57  ;;  %v1116_v48 = vand.u32 4294901760, %v1115_v23  ;;  %v1142_v54 = vand.u32 4294901760, %v8469_v21 }
  0x45   : > { %7526 = vmatprep.subr.bf16.mxu1 %v8064_v3  ;;  %7562 = vmatprep.subr.bf16.mxu0 %v8064_v3  ;;  %v1599_v44 = vand.u32 4294901760, %v1567_v26 }
  0x46   : > { %v1668_v29 = vand.u32 4294901760, %v1667_v10 }
  0x47   : > { %v8417_v60 = vpack.c.bf16 %v1602_v45, %v1599_v44  ;;  %v8437_v4 = vsub.f32 %v1567_v26, %v1599_v44 }
  0x48   : > { %7528 = vmatpush3.bf16.msra.mxu1 %v7527_v20  ;;  %7564 = vmatpush3.bf16.msra.mxu0 %v8262_v36  ;;  %v8394_v36 = vsub.f32 %v1564_v13, %v1590_v22  ;;  %v1674_v13 = vsub.f32 %v8376_v37, %v1673_v58  ;;  %v1121_v20 = vand.u32 4294901760, %v8426_v62  ;;  %v1108_v22 = vsub.f32 %v8398_v52, %v1107_v6 }
  0x49   : > { %7637 = vmatprep.subr.bf16.mxu0 %v8064_v3  ;;  %7565 = vmatprep.subr.bf16.mxu1 %v8064_v3  ;;  %v1708_v1 = vand.u32 4294901760, %v8437_v4 }
  0x4a   : > { %v1687_v12 = vand.u32 4294901760, %v8394_v36  ;;  %v1675_v32 = vand.u32 4294901760, %v1674_v13  ;;  %v1122_v44 = vsub.f32 %v8426_v62, %v1121_v20  ;;  %v1109_v47 = vand.u32 4294901760, %v1108_v22 }
  0x4b   : > { %6852 = vmatmul.mubr.f32.vlgmr.msra.gmra.mrb[0].mxu1 %v8267_v38  ;;  %6909 = vmatmul.mubr.f32.vlgmr.msra.gmra.mrb[0].mxu0 %v8260_v35  ;;  %v1680_v35 = vand.u32 4294901760, %v8383_v43  ;;  %v1034_v38 = vand.u32 4294901760, %v1007_v49 }
  0x4c   : > { %7639 = vmatpush3.bf16.msra.mxu0 %v8365_v30  ;;  %7041 = vmatprep.mubr.msk.f32.mxu0 %vm8065_vm0, %v8066_v11  ;;  %v1688_v26 = vsub.f32 %v8394_v36, %v1687_v12  ;;  %v7650_v10 = vpack.c.bf16 %v1675_v32, %v1668_v29  ;;  %v1123_v22 = vand.u32 4294901760, %v1122_v44  ;;  %v1143_v32 = vsub.f32 %v8469_v21, %v1142_v54 }
  0x4d   : > { %7640 = vmatprep.subr.bf16.mxu0 %v8064_v3  ;;  %7567 = vmatpush3.bf16.msra.mxu1 %v8387_v46  ;;  %v1681_v14 = vsub.f32 %v8383_v43, %v1680_v35  ;;  %v8462_v17 = vpack.c.bf16 %v1037_v63, %v1034_v38  ;;  %v8464_v18 = vsub.f32 %v1007_v49, %v1034_v38  ;;  %v1657_v38 = vand.u32 4294901760, %v1656_v25 }
  0x4e   : > { %7568 = vmatprep.subr.bf16.mxu1 %v8064_v3  ;;  %6927 = vmatprep.mubr.msk.f32.mxu1 %vm8065_vm0, %v8066_v11  ;;  %v1129_v49 = vsub.f32 %v8440_v5, %v1128_v24  ;;  %v1689_v13 = vand.u32 4294901760, %v1688_v26  ;;  %v1149_v25 = vand.u32 4294901760, %v8489_v34  ;;  %v7578_v26 = vpack.c.bf16 %v1116_v48, %v1109_v47 }
  0x4f   : > { %v9091_v45 = vand.u32 4294901760, %v8464_v18  ;;  %v1682_v63 = vand.u32 4294901760, %v1681_v14  ;;  %v1098_v14 = vand.u32 4294901760, %v1097_v40  ;;  %v1709_v40 = vsub.f32 %v8437_v4, %v1708_v1 }
  0x50   : > { %7642 = vmatpush3.bf16.msra.mxu0 %v8381_v42  ;;  %v1130_v29 = vand.u32 4294901760, %v1129_v49  ;;  %v1716_v47 = vsub.f32 %v8446_v8, %v1715_v16  ;;  %v1150_v48 = vsub.f32 %v8489_v34, %v1149_v25 }
  0x51   : > { %7643 = vmatprep.subr.bf16.mxu0 %v8064_v3  ;;  %7570 = vmatpush3.bf16.msra.mxu1 %v8424_v61  ;;  %v1136_v23 = vsub.f32 %v8464_v18, %v9091_v45  ;;  %v7653_v44 = vpack.c.bf16 %v1689_v13, %v1682_v63  ;;  %v1696_v45 = vand.u32 4294901760, %v1695_v0  ;;  %v1144_v63 = vand.u32 4294901760, %v1143_v32 }
  0x52   : > { %7571 = vmatprep.subr.bf16.mxu1 %v8064_v3  ;;  %v7581_v49 = vpack.c.bf16 %v1130_v29, %v1123_v22  ;;  %v1157_v0 = vsub.f32 %v8493_v39, %v1156_v28  ;;  %v1710_v13 = vand.u32 4294901760, %v1709_v40  ;;  %v1717_v15 = vand.u32 4294901760, %v1716_v47 }
  0x53   : > { %v1151_v22 = vand.u32 4294901760, %v1150_v48  ;;  %v7665_v32 = vpack.c.bf16 %v8394_v36, %v8383_v43  ;;  %v7593_v40 = vpack.c.bf16 %v8440_v5, %v8426_v62  ;;  %v7596_v47 = vpack.c.bf16 %v8469_v21, %v8464_v18 }
  0x54   : > { %7645 = vmatpush3.bf16.msra.mxu0 %v8407_v55  ;;  %v7671_v48 = vpack.c.bf16 %v8446_v8, %v8437_v4  ;;  %v9099_v43 = vand.u32 4294901760, %v8396_v51  ;;  %v9100_v36 = vand.u32 4294901760, %v8415_v59 }
  0x55   : > { %7646 = vmatprep.subr.bf16.mxu0 %v8064_v3  ;;  %7573 = vmatpush3.bf16.msra.mxu1 %v8462_v17 }
  0x56   : > { %7574 = vmatprep.subr.bf16.mxu1 %v8064_v3 }
  0x58   : > { %7648 = vmatpush3.bf16.msra.mxu0 %v8417_v60 }
  0x59   : > { %7649 = vmatprep.subr.bf16.mxu0 %v8064_v3  ;;  %7576 = vmatpush3.bf16.msra.mxu1 %v8487_v33 }
  0x5a   : > { %7577 = vmatprep.subr.bf16.mxu1 %v8064_v3 }
  0x5b   : > { %7042 = vmatmul.mubr.f32.vlgmr.msra.gmra.mrb[2].mxu0 %v1657_v38  ;;  %v1137_v38 = vand.u32 4294901760, %v1136_v23  ;;  %v1158_v23 = vand.u32 4294901760, %v1157_v0 }
  0x5c   : > { %7651 = vmatpush3.bf16.msra.mxu0 %v7650_v10  ;;  %7060 = vmatprep.mubr.msk.f32.mxu0 %vm8065_vm0, %v8066_v11  ;;  %v7656_v10 = vpack.c.bf16 %v1703_v27, %v1696_v45  ;;  %v7662_v27 = vpack.c.bf16 %v8376_v37, %v8367_v31  ;;  %v7590_v45 = vpack.c.bf16 %v8400_v53, %v8398_v52  ;;  %v9101_v53 = vand.u32 4294901760, %v8464_v18 }
  0x5d   : > { %7652 = vmatprep.subr.bf16.mxu0 %v8064_v3  ;;  %6928 = vmatmul.mubr.f32.vlgmr.msra.gmra.mrb[2].mxu1 %v1098_v14  ;;  %v7584_v14 = vpack.c.bf16 %v1144_v63, %v1137_v38  ;;  %v7587_v29 = vpack.c.bf16 %v1158_v23, %v1151_v22  ;;  %v7686_v38 = vpack.c.bf16 %v1673_v58, %v1666_v57 }
  0x5e   : > { %7579 = vmatpush3.bf16.msra.mxu1 %v7578_v26  ;;  %6946 = vmatprep.mubr.msk.f32.mxu1 %vm8065_vm0, %v8066_v11  ;;  %v7659_v26 = vpack.c.bf16 %v1717_v15, %v1710_v13  ;;  %v7614_v63 = vpack.c.bf16 %v1114_v7, %v1107_v6  ;;  %v7689_v31 = vpack.c.bf16 %v1687_v12, %v1680_v35  ;;  %v6478_v12 = vld [vmem:[%s9086_s8] ss:$0 sm:$0xff] }
  0x5f   : > { %7580 = vmatprep.subr.bf16.mxu1 %v8064_v3  ;;  %v7617_v37 = vpack.c.bf16 %v1128_v24, %v1121_v20  ;;  %v7692_v52 = vpack.c.bf16 %v9100_v36, %v9099_v43  ;;  %v7695_v57 = vpack.c.bf16 %v1715_v16, %v1708_v1 }
  0x60   : > { %7654 = vmatpush3.bf16.msra.mxu0 %v7653_v44  ;;  %v7668_v44 = vpack.c.bf16 %v8415_v59, %v8396_v51  ;;  %v7623_v51 = vpack.c.bf16 %v1156_v28, %v1149_v25 }
  0x61   : > { %7655 = vmatprep.subr.bf16.mxu0 %v8064_v3 }
  0x62   : > { %7582 = vmatpush3.bf16.msra.mxu1 %v7581_v49  ;;  %v7599_v49 = vpack.c.bf16 %v8493_v39, %v8489_v34 }
  0x63   : > { %7583 = vmatprep.subr.bf16.mxu1 %v8064_v3 }
  0x64   : > { %7657 = vmatpush3.bf16.msra.mxu0 %v7656_v10 }
  0x65   : > { %7658 = vmatprep.subr.bf16.mxu0 %v8064_v3 }
  0x66   : > { %7585 = vmatpush3.bf16.msra.mxu1 %v7584_v14 }
  0x67   : > { %7586 = vmatprep.subr.bf16.mxu1 %v8064_v3 }
  0x68   : > { %7660 = vmatpush3.bf16.msra.mxu0 %v7659_v26 }
  0x69   : > { %7661 = vmatprep.subr.bf16.mxu0 %v8064_v3 }
  0x6a   : > { %7588 = vmatpush3.bf16.msra.mxu1 %v7587_v29 }
  0x6b   : > { %7061 = vmatmul.mubr.f32.vlgmr.msra.gmra.mrb[2].mxu0 %v8378_v41  ;;  %7589 = vmatprep.subr.bf16.mxu1 %v8064_v3 }
  0x6c   : > { %7663 = vmatpush3.bf16.msra.mxu0 %v7662_v27  ;;  %7079 = vmatprep.mubr.msk.f32.mxu0 %vm8065_vm0, %v8066_v11 }
  0x6d   : > { %7664 = vmatprep.subr.bf16.mxu0 %v8064_v3  ;;  %6947 = vmatmul.mubr.f32.vlgmr.msra.gmra.mrb[2].mxu1 %v8392_v50 }
  0x6e   : > { %7591 = vmatpush3.bf16.msra.mxu1 %v7590_v45  ;;  %6965 = vmatprep.mubr.msk.f32.mxu1 %vm8065_vm0, %v8066_v11 }
  0x6f   : > { %7592 = vmatprep.subr.bf16.mxu1 %v8064_v3 }
  0x70   : > { %7666 = vmatpush3.bf16.msra.mxu0 %v7665_v32 }
  0x71   : > { %7667 = vmatprep.subr.bf16.mxu0 %v8064_v3 }
  0x72   : > { %7594 = vmatpush3.bf16.msra.mxu1 %v7593_v40 }
  0x73   : > { %7595 = vmatprep.subr.bf16.mxu1 %v8064_v3 }
  0x74   : > { %7669 = vmatpush3.bf16.msra.mxu0 %v7668_v44 }
  0x75   : > { %7670 = vmatprep.subr.bf16.mxu0 %v8064_v3 }
  0x76   : > { %7597 = vmatpush3.bf16.msra.mxu1 %v7596_v47 }
  0x77   : > { %7598 = vmatprep.subr.bf16.mxu1 %v8064_v3 }
  0x78   : > { %7672 = vmatpush3.bf16.msra.mxu0 %v7671_v48 }
  0x79   : > { %7673 = vmatprep.subr.bf16.mxu0 %v8064_v3 }
  0x7a   : > { %7600 = vmatpush3.bf16.msra.mxu1 %v7599_v49 }
  0x7b   : > { %7080 = vmatmul.mubr.f32.vlgmr.msra.gmra.mrb[2].mxu0 %v8410_v56  ;;  %7601 = vmatprep.subr.bf16.mxu1 %v8064_v3  ;;  %v7620_v56 = vpack.c.bf16 %v1142_v54, %v9101_v53 }
  0x7c   : > { %7675 = vmatpush3.bf16.msra.mxu0 %v8365_v30  ;;  %7098 = vmatprep.mubr.msk.f32.mxu0 %vm8065_vm0, %v8066_v11 }
  0x7d   : > { %7676 = vmatprep.subr.bf16.mxu0 %v8064_v3  ;;  %6966 = vmatmul.mubr.f32.vlgmr.msra.gmra.mrb[2].mxu1 %v8435_v2 }
  0x7e   : > { %7603 = vmatpush3.bf16.msra.mxu1 %v8387_v46  ;;  %6984 = vmatprep.mubr.msk.f32.mxu1 %vm8065_vm0, %v8066_v11 }
  0x7f   : > { %7604 = vmatprep.subr.bf16.mxu1 %v8064_v3 }
  0x80   : > { %7678 = vmatpush3.bf16.msra.mxu0 %v8381_v42 }
  0x81   : > { %7679 = vmatprep.subr.bf16.mxu0 %v8064_v3 }
  0x82   : > { %7606 = vmatpush3.bf16.msra.mxu1 %v8424_v61 }
  0x83   : > { %7607 = vmatprep.subr.bf16.mxu1 %v8064_v3 }
  0x84   : > { %7681 = vmatpush3.bf16.msra.mxu0 %v8407_v55 }
  0x85   : > { %7682 = vmatprep.subr.bf16.mxu0 %v8064_v3 }
  0x86   : > { %7609 = vmatpush3.bf16.msra.mxu1 %v8462_v17 }
  0x87   : > { %7610 = vmatprep.subr.bf16.mxu1 %v8064_v3 }
  0x88   : > { %7684 = vmatpush3.bf16.msra.mxu0 %v8417_v60 }
  0x89   : > { %7685 = vmatprep.subr.bf16.mxu0 %v8064_v3 }
  0x8a   : > { %7612 = vmatpush3.bf16.msra.mxu1 %v8487_v33 }
  0x8b   : > { %7099 = vmatmul.mubr.f32.vlgmr.msra.gmra.mrb[2].mxu0 %v1655_v9  ;;  %7613 = vmatprep.subr.bf16.mxu1 %v8064_v3 }
  0x8c   : > { %7687 = vmatpush3.bf16.msra.mxu0 %v7686_v38  ;;  %7117 = vmatprep.mubr.msk.f32.mxu0 %vm8065_vm0, %v8066_v11 }
  0x8d   : > { %7688 = vmatprep.subr.bf16.mxu0 %v8064_v3  ;;  %6985 = vmatmul.mubr.f32.vlgmr.msra.gmra.mrb[2].mxu1 %v1096_v19 }
  0x8e   : > { %7615 = vmatpush3.bf16.msra.mxu1 %v7614_v63  ;;  %7003 = vmatprep.mubr.msk.f32.mxu1 %vm8065_vm0, %v8066_v11 }
  0x8f   : > { %7616 = vmatprep.subr.bf16.mxu1 %v8064_v3 }
  0x90   : > { %7690 = vmatpush3.bf16.msra.mxu0 %v7689_v31 }
  0x91   : > { %7691 = vmatprep.subr.bf16.mxu0 %v8064_v3 }
  0x92   : > { %7618 = vmatpush3.bf16.msra.mxu1 %v7617_v37 }
  0x93   : > { %7619 = vmatprep.subr.bf16.mxu1 %v8064_v3 }
  0x94   : > { %7693 = vmatpush3.bf16.msra.mxu0 %v7692_v52 }
  0x95   : > { %7694 = vmatprep.subr.bf16.mxu0 %v8064_v3 }
  0x96   : > { %7621 = vmatpush3.bf16.msra.mxu1 %v7620_v56 }
  0x97   : > { %7622 = vmatprep.subr.bf16.mxu1 %v8064_v3 }
  0x98   : > { %7696 = vmatpush3.bf16.msra.mxu0 %v7695_v57 }
  0x99   : > { %7697 = vmatprep.subr.bf16.mxu0 %v8064_v3 }
  0x9a   : > { %7624 = vmatpush3.bf16.msra.mxu1 %v7623_v51 }
  0x9b   : > { %7118 = vmatmul.mubr.f32.vlgmr.msra.gmra.mrb[2].mxu0 %v8378_v41  ;;  %7625 = vmatprep.subr.bf16.mxu1 %v8064_v3 }
  0x9c   : > { %7699 = vmatpush3.bf16.msra.mxu0 %v8365_v30  ;;  %7136 = vmatprep.mubr.msk.f32.mxu0 %vm8065_vm0, %v8066_v11  ;;  %v6477_v30 = vld [vmem:[%s9085_s7] ss:$0 sm:$0xff] }
  0x9d   : > { %7700 = vmatprep.subr.bf16.mxu0 %v8064_v3  ;;  %7004 = vmatmul.mubr.f32.vlgmr.msra.gmra.mrb[2].mxu1 %v8392_v50 }
  0x9e   : > { %7627 = vmatpush3.bf16.msra.mxu1 %v8387_v46  ;;  %7022 = vmatprep.mubr.msk.f32.mxu1 %vm8065_vm0, %v8066_v11 }
  0x9f   : > { %7628 = vmatprep.subr.bf16.mxu1 %v8064_v3 }
  0xa0   : > { %7702 = vmatpush3.bf16.msra.mxu0 %v8381_v42 }
  0xa1   : > { %7703 = vmatprep.subr.bf16.mxu0 %v8064_v3 }
  0xa2   : > { %7630 = vmatpush3.bf16.msra.mxu1 %v8424_v61  ;;  %v6479_v61 = vld [vmem:[%s9084_s6] ss:$0 sm:$0xff] }
  0xa3   : > { %7631 = vmatprep.subr.bf16.mxu1 %v8064_v3 }
  0xa4   : > { %7705 = vmatpush3.bf16.msra.mxu0 %v8407_v55 }
  0xa5   : > { %7706 = vmatprep.subr.bf16.mxu0 %v8064_v3 }
  0xa6   : > { %7633 = vmatpush3.bf16.msra.mxu1 %v8462_v17 }
  0xa7   : > { %7634 = vmatprep.subr.bf16.mxu1 %v8064_v3 }
  0xa8   : > { %7708 = vmatpush3.bf16.msra.mxu0 %v8417_v60 }
  0xa9   : > { %7259 = vmatprep.subr.mxu0 %v8066_v11 }
  0xaa   : > { %7636 = vmatpush3.bf16.msra.mxu1 %v8487_v33 }
  0xab   : > { %7137 = vmatmul.mubr.f32.vlgmr.msra.gmra.mrb[2].mxu0 %v8378_v41  ;;  %7139 = vmatprep.subr.mxu1 %v8066_v11 }
  0xac   : > { %7261 = vmatprep.mubr.msk.f32.mxu0 %vm8065_vm0, %v8066_v11 }
  0xad   : > { %7023 = vmatmul.mubr.f32.vlgmr.msra.gmra.mrb[2].mxu1 %v8392_v50 }
  0xae   : > { %7141 = vmatprep.mubr.msk.f32.mxu1 %vm8065_vm0, %v8066_v11 }
 0x11e   : > { %v744_v42 = vpop.f32.mrb[0].mxu1  ;;  %v999_v46 = vpop.f32.mrb[0].mxu0 }
 0x11f   : > { %v7781_v55 = vadd.f32 %v6477_v30, %v744_v42  ;;  %v6910_v58 = vpop.f32.mrb[1].mxu0  ;;  %v6853_v59 = vpop.f32.mrb[1].mxu1 }
 0x121   : > { %v7782_v41 = vadd.f32 %v7781_v55, %v999_v46 }
 0x123   : > { %1558 = vst.msk [vmem:[#allocation2] sm:$0xff] %vm462_vm1, %v7782_v41 }
 0x12a   : > { %v2117_v60 = vld [vmem:[#allocation2] sm:$0xff] }
 0x12b   : > { %3035 = vrot.lane.b32.xlu1 %v2117_v60, %s8067_s23  ;;  %v2124_v50 = vsel %vm2119_vm2, %v2117_v60, 0 }
 0x12c   : > { %v2127_v35 = vand.u32 4294901760, %v2124_v50 }
 0x12e   : > { %7140 = vmatpush3.xpose.msra.mxu1 %v2127_v35  ;;  %v2204_v5 = vsub.f32 %v2124_v50, %v2127_v35 }
 0x12f   : > { %7144 = vmatprep.subr.mxu1 %v8066_v11 }
 0x130   : > { %v2205_v8 = vand.u32 4294901760, %v2204_v5 }
 0x132   : > { %v2206_v21 = vsub.f32 %v2204_v5, %v2205_v8 }
 0x134   : > { %v2207_v33 = vand.u32 4294901760, %v2206_v21 }
 0x17e   : > { %v2113_v62 = vpop.f32.mrb[2].mxu0 }
 0x17f   : > { %v8689_v2 = vadd.f32 %v6479_v61, %v2113_v62  ;;  %v7138_v4 = vpop.f32.mrb[3].mxu0 }
 0x180   : > { %v1554_v17 = vpop.f32.mrb[2].mxu1 }
 0x181   : > { %v2121_v6 = vsel %vm2119_vm2, %v8689_v2, 0  ;;  %3951 = vrot.lane.b32.xlu1 %v8689_v2, %s8068_s16  ;;  %v7783_v18 = vadd.f32 %v6478_v12, %v1554_v17  ;;  %v7024_v19 = vpop.f32.mrb[3].mxu1 }
 0x182   : > { %v2192_v7 = vand.u32 4294901760, %v2121_v6 }
 0x183   : > { %1559 = vst.msk [vmem:[#allocation3] sm:$0xff] %vm462_vm1, %v7783_v18 }
 0x184   : > { %v2193_v9 = vsub.f32 %v2121_v6, %v2192_v7 }
 0x185   : > { %3953 = vrot.lane.b32.xlu1 %v2117_v60, %s8068_s16 }
 0x186   : > { %v2194_v20 = vand.u32 4294901760, %v2193_v9 }
 0x188   : > { %v2195_v24 = vsub.f32 %v2193_v9, %v2194_v20 }
 0x189   : > { %4868 = vrot.lane.b32.xlu1 %v8689_v2, %s8069_s26 }
 0x18a   : > { %v2196_v28 = vand.u32 4294901760, %v2195_v24  ;;  %v8718_v34 = vld [vmem:[#allocation3] sm:$0xff] }
 0x18b   : > { %v8721_v39 = vand.u32 4294901760, %v8718_v34 }
 0x18c   : > { %7142 = vmatmul.mubr.f32.vlgmr.msra.gmra.mrb[4].mxu1 %v2196_v28 }
 0x18d   : > { %7145 = vmatpush3.xpose.msra.mxu1 %v2207_v33  ;;  %4870 = vrot.lane.b32.xlu1 %v2117_v60, %s8069_s26  ;;  %v2663_v41 = vsub.f32 %v8718_v34, %v8721_v39 }
 0x18e   : > { %7146 = vmatprep.mubr.msk.f32.mxu1 %vm8065_vm0, %v8066_v11  ;;  %7149 = vmatprep.subr.mxu1 %v8066_v11 }
 0x18f   : > { %v2664_v4 = vand.u32 4294901760, %v2663_v41 }
 0x194   : > { %7147 = vmatmul.mubr.f32.vlgmr.msra.gmra.mrb[4].mxu1 %v2192_v7 }
 0x195   : > { %7150 = vmatpush3.xpose.msra.mxu1 %v2204_v5  ;;  %7151 = vmatprep.mubr.msk.f32.mxu1 %vm8065_vm0, %v8066_v11 }
 0x196   : > { %7154 = vmatprep.subr.mxu1 %v8066_v11 }
 0x19c   : > { %7152 = vmatmul.mubr.f32.vlgmr.msra.gmra.mrb[4].mxu1 %v2193_v9 }
 0x19d   : > { %7155 = vmatpush3.xpose.msra.mxu1 %v2127_v35  ;;  %7156 = vmatprep.mubr.msk.f32.mxu1 %vm8065_vm0, %v8066_v11  ;;  %v8727_v54 = vpop.permute.xlu1 %3035 }
 0x19e   : > { %7159 = vmatprep.subr.mxu1 %v8066_v11  ;;  %v3039_v19 = vsel %vm2119_vm2, %v8727_v54, 0 }
 0x19f   : > { %v3042_v21 = vand.u32 4294901760, %v3039_v19 }
 0x1a1   : > { %v3119_v28 = vsub.f32 %v3039_v19, %v3042_v21 }
 0x1a3   : > { %v3120_v54 = vand.u32 4294901760, %v3119_v28 }
 0x1a4   : > { %7157 = vmatmul.mubr.f32.vlgmr.msra.gmra.mrb[4].mxu1 %v2194_v20 }
 0x1a5   : > { %7160 = vmatpush3.xpose.msra.mxu1 %v2205_v8  ;;  %7161 = vmatprep.mubr.msk.f32.mxu1 %vm8065_vm0, %v8066_v11 }
 0x1a6   : > { %7164 = vmatprep.subr.mxu1 %v8066_v11 }
 0x1ac   : > { %7162 = vmatmul.mubr.f32.vlgmr.msra.gmra.mrb[4].mxu1 %v2192_v7 }
 0x1ad   : > { %7165 = vmatpush3.xpose.msra.mxu1 %v2127_v35  ;;  %7166 = vmatprep.mubr.msk.f32.mxu1 %vm8065_vm0, %v8066_v11 }
 0x1ae   : > { %7169 = vmatprep.subr.mxu1 %v8066_v11 }
 0x1b4   : > { %7167 = vmatmul.mubr.f32.vlgmr.msra.gmra.mrb[4].mxu1 %v2192_v7  ;;  %v2665_v7 = vsub.f32 %v2663_v41, %v2664_v4 }
 0x1b5   : > { %7170 = vmatpush3.msra.mxu1 %v8721_v39  ;;  %7171 = vmatprep.mubr.msk.f32.mxu1 %vm8065_vm0, %v8066_v11 }
 0x1b6   : > { %7174 = vmatprep.subr.mxu1 %v8066_v11  ;;  %v2666_v12 = vand.u32 4294901760, %v2665_v7 }
 0x1f3   : > { %v3952_v1 = vpop.permute.xlu1 %3951 }
 0x1f4   : > { %v3955_v16 = vsel %vm2119_vm2, %v3952_v1, 0 }
 0x1f5   : > { %v4025_v25 = vand.u32 4294901760, %v3955_v16 }
 0x1f7   : > { %v4026_v0 = vsub.f32 %v3955_v16, %v4025_v25  ;;  %v3954_v10 = vpop.permute.xlu1 %3953  ;;  %v3121_v16 = vsub.f32 %v3119_v28, %v3120_v54 }
 0x1f8   : > { %v3957_v13 = vsel %vm2119_vm2, %v3954_v10, 0 }
 0x1f9   : > { %v4027_v15 = vand.u32 4294901760, %v4026_v0  ;;  %v3960_v14 = vand.u32 4294901760, %v3957_v13 }
 0x1fb   : > { %v4028_v22 = vsub.f32 %v4026_v0, %v4027_v15  ;;  %v4037_v23 = vsub.f32 %v3957_v13, %v3960_v14  ;;  %7260 = vmatpush3.xpose.msra.mxu0 %v3960_v14  ;;  %v4869_v32 = vpop.permute.xlu1 %4868 }
 0x1fc   : > { %7264 = vmatprep.subr.mxu0 %v8066_v11  ;;  %v4872_v44 = vsel %vm2119_vm2, %v4869_v32, 0 }
 0x1fd   : > { %v4029_v26 = vand.u32 4294901760, %v4028_v22  ;;  %v4038_v29 = vand.u32 4294901760, %v4037_v23  ;;  %v4942_v48 = vand.u32 4294901760, %v4872_v44 }
 0x1ff   : > { %v4039_v27 = vsub.f32 %v4037_v23, %v4038_v29  ;;  %7262 = vmatmul.mubr.f32.vlgmr.msra.gmra.mrb[4].mxu0 %v4029_v26  ;;  %v4871_v40 = vpop.permute.xlu1 %4870  ;;  %v4943_v38 = vsub.f32 %v4872_v44, %v4942_v48 }
 0x200   : > { %7266 = vmatprep.mubr.msk.f32.mxu0 %vm8065_vm0, %v8066_v11  ;;  %v4874_v47 = vsel %vm2119_vm2, %v4871_v40, 0 }
 0x201   : > { %v4040_v45 = vand.u32 4294901760, %v4039_v27  ;;  %v4877_v49 = vand.u32 4294901760, %v4874_v47  ;;  %v4944_v31 = vand.u32 4294901760, %v4943_v38 }
 0x203   : > { %7265 = vmatpush3.xpose.msra.mxu0 %v4040_v45  ;;  %v4954_v63 = vsub.f32 %v4874_v47, %v4877_v49  ;;  %v4945_v43 = vsub.f32 %v4943_v38, %v4944_v31 }
 0x204   : > { %7269 = vmatprep.subr.mxu0 %v8066_v11 }
 0x205   : > { %v4955_v37 = vand.u32 4294901760, %v4954_v63  ;;  %v4946_v52 = vand.u32 4294901760, %v4945_v43 }
 0x207   : > { %7267 = vmatmul.mubr.f32.vlgmr.msra.gmra.mrb[4].mxu0 %v4025_v25  ;;  %v4956_v36 = vsub.f32 %v4954_v63, %v4955_v37 }
 0x208   : > { %7270 = vmatpush3.xpose.msra.mxu0 %v4037_v23  ;;  %7271 = vmatprep.mubr.msk.f32.mxu0 %vm8065_vm0, %v8066_v11 }
 0x209   : > { %7274 = vmatprep.subr.mxu0 %v8066_v11  ;;  %v4957_v53 = vand.u32 4294901760, %v4956_v36 }
 0x20f   : > { %7272 = vmatmul.mubr.f32.vlgmr.msra.gmra.mrb[4].mxu0 %v4026_v0  ;;  %v3122_v0 = vand.u32 4294901760, %v3121_v16 }
 0x210   : > { %7275 = vmatpush3.xpose.msra.mxu0 %v3960_v14  ;;  %7276 = vmatprep.mubr.msk.f32.mxu0 %vm8065_vm0, %v8066_v11 }
 0x211   : > { %7279 = vmatprep.subr.mxu0 %v8066_v11 }
 0x217   : > { %7277 = vmatmul.mubr.f32.vlgmr.msra.gmra.mrb[4].mxu0 %v4027_v15 }
 0x218   : > { %7280 = vmatpush3.xpose.msra.mxu0 %v4038_v29  ;;  %7281 = vmatprep.mubr.msk.f32.mxu0 %vm8065_vm0, %v8066_v11 }
 0x219   : > { %7284 = vmatprep.subr.mxu0 %v8066_v11 }
 0x21f   : > { %7282 = vmatmul.mubr.f32.vlgmr.msra.gmra.mrb[4].mxu0 %v4025_v25 }
 0x220   : > { %7285 = vmatpush3.xpose.msra.mxu0 %v3960_v14  ;;  %7286 = vmatprep.mubr.msk.f32.mxu0 %vm8065_vm0, %v8066_v11 }
 0x221   : > { %7319 = vmatprep.subr.mxu0 %v8066_v11 }
 0x227   : > { %7287 = vmatmul.mubr.f32.vlgmr.msra.gmra.mrb[4].mxu0 %v4025_v25 }
 0x228   : > { %7320 = vmatpush3.xpose.msra.mxu0 %v4877_v49  ;;  %7321 = vmatprep.mubr.msk.f32.mxu0 %vm8065_vm0, %v8066_v11 }
 0x229   : > { %7324 = vmatprep.subr.mxu0 %v8066_v11 }
 0x22b   : > { %7322 = vmatmul.mubr.f32.vlgmr.msra.gmra.mrb[6].mxu0 %v4946_v52 }
 0x22c   : > { %7325 = vmatpush3.xpose.msra.mxu0 %v4957_v53  ;;  %7326 = vmatprep.mubr.msk.f32.mxu0 %vm8065_vm0, %v8066_v11 }
 0x22d   : > { %7329 = vmatprep.subr.mxu0 %v8066_v11 }
 0x233   : > { %7327 = vmatmul.mubr.f32.vlgmr.msra.gmra.mrb[6].mxu0 %v4942_v48 }
 0x234   : > { %7330 = vmatpush3.xpose.msra.mxu0 %v4954_v63  ;;  %7331 = vmatprep.mubr.msk.f32.mxu0 %vm8065_vm0, %v8066_v11 }
 0x235   : > { %7334 = vmatprep.subr.mxu0 %v8066_v11 }
 0x23b   : > { %7332 = vmatmul.mubr.f32.vlgmr.msra.gmra.mrb[6].mxu0 %v4943_v38 }
 0x23c   : > { %7335 = vmatpush3.xpose.msra.mxu0 %v4877_v49  ;;  %7336 = vmatprep.mubr.msk.f32.mxu0 %vm8065_vm0, %v8066_v11 }
 0x23d   : > { %7339 = vmatprep.subr.mxu0 %v8066_v11 }
 0x243   : > { %7337 = vmatmul.mubr.f32.vlgmr.msra.gmra.mrb[6].mxu0 %v4944_v31 }
 0x244   : > { %7340 = vmatpush3.xpose.msra.mxu0 %v4955_v37  ;;  %7341 = vmatprep.mubr.msk.f32.mxu0 %vm8065_vm0, %v8066_v11 }
 0x245   : > { %7344 = vmatprep.subr.mxu0 %v8066_v11 }
 0x24b   : > { %7342 = vmatmul.mubr.f32.vlgmr.msra.gmra.mrb[6].mxu0 %v4942_v48 }
 0x24c   : > { %7345 = vmatpush3.xpose.msra.mxu0 %v4877_v49  ;;  %7346 = vmatprep.mubr.msk.f32.mxu0 %vm8065_vm0, %v8066_v11 }
 0x24d   : > { %7709 = vmatprep.subr.bf16.mxu0 %v8064_v3 }
 0x253   : > { %7347 = vmatmul.mubr.f32.vlgmr.msra.gmra.mrb[6].mxu0 %v4942_v48 }
 0x254   : > { %7395 = vmatprep.mubr.msk.f32.mxu0 %vm8065_vm0, %v8066_v11 }
 0x287   : > { %v2568_v56 = vpop.f32.mrb[4].mxu1 }
 0x288   : > { %v7168_v57 = vpop.f32.mrb[5].mxu1  ;;  %v2573_v51 = vsel %vm2572_vm3, %v2568_v56, -inf }
 0x289   : > { %2574 = vmax.xlane.f32.xlu0 %v2573_v51 }
 0x29f   : > { %3033 = vrot.lane.b32.xlu0 %v8689_v2, %s8067_s23 }
 0x2a3   : > { %3497 = vrot.lane.b32.xlu0 %v8718_v34, %s8067_s23 }
 0x2fa   : > { %v8774_v30 = vpop.f32.mrb[4].mxu0 }
 0x2fb   : > { %v7288_v42 = vpop.f32.mrb[5].mxu0  ;;  %v4405_v46 = vsel %vm2572_vm3, %v8774_v30, -inf }
 0x2fc   : > { %4406 = vmax.xlane.f32.xlu0 %v4405_v46 }
 0x316   : > { %v2575_v55 = vpop.xlane.xlu0 %2574 }
 0x317   : > { %v2576_v58 = vsub.f32 %v2568_v56, %v2575_v55 }
 0x319   : > { %v2577_v59 = vmul.f32 1.442695, %v2576_v58 }
 0x31a   : > { %v3034_v17 = vpop.permute.xlu0 %3033 }
 0x31b   : > { %7968 = vpow2.f32 %v2577_v59  ;;  %v3037_v18 = vsel %vm2119_vm2, %v3034_v17, 0 }
 0x31c   : > { %v3107_v20 = vand.u32 4294901760, %v3037_v18 }
 0x31e   : > { %v3108_v24 = vsub.f32 %v3037_v18, %v3107_v20 }
 0x320   : > { %v3109_v33 = vand.u32 4294901760, %v3108_v24 }
 0x322   : > { %v3110_v1 = vsub.f32 %v3108_v24, %v3109_v33 }
 0x324   : > { %v3111_v25 = vand.u32 4294901760, %v3110_v1 }
 0x325   : > { %v8780_v60 = vpop.eup %7968 }
 0x326   : > { %v2583_v50 = vsel %vm2572_vm3, %v8780_v60, 0  ;;  %v8784_v35 = vpop.f32.mrb[6].mxu0  ;;  %v2579_v42 = vsel %vm2572_vm3, %v8780_v60, 0.0 }
 0x327   : > { %v2651_v61 = vand.u32 4294901760, %v2583_v50  ;;  %v7348_v62 = vpop.f32.mrb[7].mxu0  ;;  %v5322_v2 = vsel %vm2572_vm3, %v8784_v35, -inf }
 0x328   : > { %5323 = vmax.xlane.f32.xlu0 %v5322_v2 }
 0x329   : > { %v2652_v5 = vsub.f32 %v2583_v50, %v2651_v61 }
 0x32b   : > { %v2653_v6 = vand.u32 4294901760, %v2652_v5 }
 0x32d   : > { %v2654_v8 = vsub.f32 %v2652_v5, %v2653_v6 }
 0x32f   : > { %v2655_v9 = vand.u32 4294901760, %v2654_v8 }
 0x331   : > { %7172 = vmatmul.mubr.f32.vlgmr.msra.gmra.mrb[6].mxu1 %v2655_v9 }
 0x332   : > { %7175 = vmatpush3.msra.mxu1 %v2666_v12  ;;  %7176 = vmatprep.mubr.msk.f32.mxu1 %vm8065_vm0, %v8066_v11 }
 0x333   : > { %7179 = vmatprep.subr.mxu1 %v8066_v11 }
 0x339   : > { %7177 = vmatmul.mubr.f32.vlgmr.msra.gmra.mrb[6].mxu1 %v2651_v61 }
 0x33a   : > { %7180 = vmatpush3.msra.mxu1 %v2663_v41  ;;  %7181 = vmatprep.mubr.msk.f32.mxu1 %vm8065_vm0, %v8066_v11 }
 0x33b   : > { %7184 = vmatprep.subr.mxu1 %v8066_v11 }
 0x33e   : > { %5331 = vrot.lane.b32.xlu0 %v8718_v34, %s8069_s26  ;;  %s7984_s26 = scalar_lea.vmem %s9032_s28, 128 }
 0x33f   : > { %p7985_p12 = scmp.ne.s32.totalorder %s9032_s28, %s7984_s26 }
 0x341   : > { %7182 = vmatmul.mubr.f32.vlgmr.msra.gmra.mrb[6].mxu1 %v2652_v5  ;;  %p7986_p13 = pnand %p7985_p12, %p8174_p4 }
 0x342   : > { %7185 = vmatpush3.msra.mxu1 %v8721_v39  ;;  %7186 = vmatprep.mubr.msk.f32.mxu1 %vm8065_vm0, %v8066_v11 }
 0x343   : > { %7189 = vmatprep.subr.mxu1 %v8066_v11  ;;  %p7987_p0 = pneg %p7986_p13 }
 0x349   : > { %7187 = vmatmul.mubr.f32.vlgmr.msra.gmra.mrb[6].mxu1 %v2653_v6 }
 0x34a   : > { %7190 = vmatpush3.msra.mxu1 %v2664_v4  ;;  %7191 = vmatprep.mubr.msk.f32.mxu1 %vm8065_vm0, %v8066_v11 }
 0x34b   : > { %7194 = vmatprep.subr.mxu1 %v8066_v11 }
 0x351   : > { %7192 = vmatmul.mubr.f32.vlgmr.msra.gmra.mrb[6].mxu1 %v2651_v61 }
 0x352   : > { %7195 = vmatpush3.msra.mxu1 %v8721_v39  ;;  %7196 = vmatprep.mubr.msk.f32.mxu1 %vm8065_vm0, %v8066_v11  ;;  %v3498_v39 = vpop.permute.xlu0 %3497 }
 0x353   : > { %7199 = vmatprep.subr.mxu1 %v8066_v11  ;;  %v8828_v10 = vand.u32 4294901760, %v3498_v39 }
 0x355   : > { %v3581_v63 = vsub.f32 %v3498_v39, %v8828_v10 }
 0x359   : > { %7197 = vmatmul.mubr.f32.vlgmr.msra.gmra.mrb[6].mxu1 %v2651_v61 }
 0x35a   : > { %7200 = vmatpush3.xpose.msra.mxu1 %v3042_v21  ;;  %7201 = vmatprep.mubr.msk.f32.mxu1 %vm8065_vm0, %v8066_v11 }
 0x35b   : > { %7204 = vmatprep.subr.mxu1 %v8066_v11 }
 0x35d   : > { %7202 = vmatmul.mubr.f32.vlgmr.msra.gmra.mrb[8].mxu1 %v3111_v25 }
 0x35e   : > { %7205 = vmatpush3.xpose.msra.mxu1 %v3122_v0  ;;  %7206 = vmatprep.mubr.msk.f32.mxu1 %vm8065_vm0, %v8066_v11 }
 0x35f   : > { %7209 = vmatprep.subr.mxu1 %v8066_v11 }
 0x365   : > { %7207 = vmatmul.mubr.f32.vlgmr.msra.gmra.mrb[8].mxu1 %v3107_v20 }
 0x366   : > { %7210 = vmatpush3.xpose.msra.mxu1 %v3119_v28  ;;  %7211 = vmatprep.mubr.msk.f32.mxu1 %vm8065_vm0, %v8066_v11 }
 0x367   : > { %7214 = vmatprep.subr.mxu1 %v8066_v11 }
 0x36d   : > { %7212 = vmatmul.mubr.f32.vlgmr.msra.gmra.mrb[8].mxu1 %v3108_v24 }
 0x36e   : > { %7215 = vmatpush3.xpose.msra.mxu1 %v3042_v21  ;;  %7216 = vmatprep.mubr.msk.f32.mxu1 %vm8065_vm0, %v8066_v11 }
 0x36f   : > { %7219 = vmatprep.subr.mxu1 %v8066_v11 }
 0x375   : > { %7217 = vmatmul.mubr.f32.vlgmr.msra.gmra.mrb[8].mxu1 %v3109_v33 }
 0x376   : > { %7220 = vmatpush3.xpose.msra.mxu1 %v3120_v54  ;;  %7221 = vmatprep.mubr.msk.f32.mxu1 %vm8065_vm0, %v8066_v11 }
 0x377   : > { %7224 = vmatprep.subr.mxu1 %v8066_v11 }
 0x37d   : > { %7222 = vmatmul.mubr.f32.vlgmr.msra.gmra.mrb[8].mxu1 %v3107_v20 }
 0x37e   : > { %7225 = vmatpush3.xpose.msra.mxu1 %v3042_v21  ;;  %7226 = vmatprep.mubr.msk.f32.mxu1 %vm8065_vm0, %v8066_v11 }
 0x37f   : > { %7229 = vmatprep.subr.mxu1 %v8066_v11 }
 0x385   : > { %7227 = vmatmul.mubr.f32.vlgmr.msra.gmra.mrb[8].mxu1 %v3107_v20 }
 0x386   : > { %7230 = vmatpush3.msra.mxu1 %v8828_v10  ;;  %7231 = vmatprep.mubr.msk.f32.mxu1 %vm8065_vm0, %v8066_v11 }
 0x387   : > { %7234 = vmatprep.subr.mxu1 %v8066_v11 }
 0x389   : > { %v4407_v13 = vpop.xlane.xlu0 %4406 }
 0x38a   : > { %v4408_v15 = vsub.f32 %v8774_v30, %v4407_v13  ;;  %v5803_v13 = vld [vmem:[%s9087_s9 + $0x8] sm:$0xff] }
 0x38c   : > { %v4409_v14 = vmul.f32 1.442695, %v4408_v15 }
 0x38e   : > { %7970 = vpow2.f32 %v4409_v14  ;;  %v5824_v14 = vand.u32 4294901760, %v5803_v13 }
 0x398   : > { %v7971_v22 = vpop.eup %7970 }
 0x399   : > { %v4411_v23 = vsel %vm2572_vm3, %v7971_v22, 0.0  ;;  %v4418_v58 = vsel %vm2572_vm3, %v7971_v22, 0 }
 0x39a   : > { %4412 = vadd.xlane.f32.xlu0 %v4411_v23  ;;  %v4486_v41 = vand.u32 4294901760, %v4418_v58 }
 0x39c   : > { %v4487_v50 = vsub.f32 %v4418_v58, %v4486_v41 }
 0x39e   : > { %v4488_v61 = vand.u32 4294901760, %v4487_v50 }
 0x3a0   : > { %v4489_v2 = vsub.f32 %v4487_v50, %v4488_v61 }
 0x3a2   : > { %v4490_v5 = vand.u32 4294901760, %v4489_v2 }
 0x3b5   : > { %v5324_v40 = vpop.xlane.xlu0 %5323 }
 0x3b6   : > { %v5325_v44 = vsub.f32 %v8784_v35, %v5324_v40 }
 0x3b8   : > { %v5326_v49 = vmul.f32 1.442695, %v5325_v44  ;;  %v5804_v44 = vld [vmem:[%s9087_s9 + $0x10] sm:$0xff] }
 0x3b9   : > { %v5332_v8 = vpop.permute.xlu0 %5331 }
 0x3ba   : > { %v5338_v12 = vand.u32 4294901760, %v5332_v8 }
 0x3bc   : > { %v5415_v18 = vsub.f32 %v5332_v8, %v5338_v12 }
 0x3be   : > { %v5416_v20 = vand.u32 4294901760, %v5415_v18 }
 0x3c0   : > { %v5417_v24 = vsub.f32 %v5415_v18, %v5416_v20 }
 0x3c2   : > { %v5418_v33 = vand.u32 4294901760, %v5417_v24 }
 0x427   : > { %v4413_v39 = vpop.xlane.xlu0 %4412 }
 0x42c   : > { %v8836_v26 = vpop.f32.mrb[6].mxu1 }
 0x42d   : > { %v7198_v29 = vpop.f32.mrb[7].mxu1 }
 0x42e   : > { %v8912_v29 = vsub.f32 %v5803_v13, %v5824_v14 }
 0x458   : > { %v3483_v27 = vpop.f32.mrb[8].mxu1 }
 0x459   : > { %v7228_v45 = vpop.f32.mrb[9].mxu1  ;;  %v3487_v32 = vsel %vm2572_vm3, %v3483_v27, -inf }
 0x45a   : > { %3488 = vmax.xlane.f32.xlu1 %v3487_v32 }
 0x46b   : > { %4414 = vrot.lane.b32.xlu1 %v8718_v34, %s8068_s16  ;;  %v3582_v34 = vand.u32 4294901760, %v3581_v63  ;;  %s8072_s16 = smov 48  }
 0x46d   : > { %v3583_v51 = vsub.f32 %v3581_v63, %v3582_v34 }
 0x46f   : > { %v3584_v55 = vand.u32 4294901760, %v3583_v51 }
 0x4e7   : > { %v3489_v47 = vpop.xlane.xlu1 %3488 }
 0x4e8   : > { %v3490_v48 = vsub.f32 %v3483_v27, %v3489_v47  ;;  %v5805_v47 = vld [vmem:[%s9087_s9 + $0x18] sm:$0xff] }
 0x4ea   : > { %v3491_v38 = vmul.f32 1.442695, %v3490_v48 }
 0x4eb   : > { %v4415_v59 = vpop.permute.xlu1 %4414 }
 0x4ec   : > { %7972 = vpow2.f32 %v3491_v38  ;;  %v4421_v60 = vand.u32 4294901760, %v4415_v59  ;;  %v5830_v38 = vand.u32 4294901760, %v5805_v47 }
 0x4ed   : > { %7974 = vpow2.f32 %v5326_v49  ;;  %v5827_v49 = vand.u32 4294901760, %v5804_v44 }
 0x4ee   : > { %v4498_v35 = vsub.f32 %v4415_v59, %v4421_v60 }
 0x4f0   : > { %v4499_v62 = vand.u32 4294901760, %v4498_v35 }
 0x4f2   : > { %v4500_v4 = vsub.f32 %v4498_v35, %v4499_v62 }
 0x4f4   : > { %v4501_v6 = vand.u32 4294901760, %v4500_v4 }
 0x4f6   : > { %v7973_v31 = vpop.eup %7972 }
 0x4f7   : > { %v3501_v37 = vsel %vm2572_vm3, %v7973_v31, 0  ;;  %v3493_v43 = vsel %vm2572_vm3, %v7973_v31, 0.0  ;;  %v7975_v36 = vpop.eup %7974  ;;  %v5806_v31 = vld [vmem:[%s9087_s9 + $0x20] sm:$0xff] }
 0x4f8   : > { %v3569_v52 = vand.u32 4294901760, %v3501_v37  ;;  %3494 = vadd.xlane.f32.xlu1 %v3493_v43  ;;  %v5328_v56 = vsel %vm2572_vm3, %v7975_v36, 0.0  ;;  %v5335_v7 = vsel %vm2572_vm3, %v7975_v36, 0  ;;  %v5833_v43 = vand.u32 4294901760, %v5806_v31 }
 0x4f9   : > { %v5403_v9 = vand.u32 4294901760, %v5335_v7 }
 0x4fa   : > { %v3570_v53 = vsub.f32 %v3501_v37, %v3569_v52  ;;  %v5807_v37 = vld [vmem:[%s9087_s9 + $0x28] sm:$0xff] }
 0x4fb   : > { %v5404_v17 = vsub.f32 %v5335_v7, %v5403_v9  ;;  %v5836_v36 = vand.u32 4294901760, %v5807_v37 }
 0x4fc   : > { %5329 = vadd.xlane.f32.xlu1 %v5328_v56  ;;  %v3571_v57 = vand.u32 4294901760, %v3570_v53 }
 0x4fd   : > { %v5405_v19 = vand.u32 4294901760, %v5404_v17  ;;  %v8949_v58 = vsub.f32 %v5807_v37, %v5836_v36 }
 0x4fe   : > { %v3572_v30 = vsub.f32 %v3570_v53, %v3571_v57 }
 0x4ff   : > { %v5406_v21 = vsub.f32 %v5404_v17, %v5405_v19 }
 0x500   : > { %2580 = vadd.xlane.f32.xlu1 %v2579_v42  ;;  %v3573_v46 = vand.u32 4294901760, %v3572_v30  ;;  %v5913_v30 = vand.u32 4294901760, %v8912_v29  ;;  %v8943_v42 = vsub.f32 %v5804_v44, %v5827_v49 }
 0x501   : > { %v5407_v28 = vand.u32 4294901760, %v5406_v21  ;;  %v5941_v21 = vand.u32 4294901760, %v8949_v58 }
 0x502   : > { %7232 = vmatmul.mubr.f32.vlgmr.msra.gmra.mrb[10].mxu1 %v3573_v46  ;;  %v8945_v46 = vsub.f32 %v5805_v47, %v5830_v38 }
 0x503   : > { %7235 = vmatpush3.msra.mxu1 %v3584_v55  ;;  %7236 = vmatprep.mubr.msk.f32.mxu1 %vm8065_vm0, %v8066_v11  ;;  %v8947_v55 = vsub.f32 %v5806_v31, %v5833_v43 }
 0x504   : > { %7239 = vmatprep.subr.mxu1 %v8066_v11  ;;  %v5927_v2 = vand.u32 4294901760, %v8945_v46 }
 0x50a   : > { %7237 = vmatmul.mubr.f32.vlgmr.msra.gmra.mrb[10].mxu1 %v3569_v52 }
 0x50b   : > { %7240 = vmatpush3.msra.mxu1 %v3581_v63  ;;  %7241 = vmatprep.mubr.msk.f32.mxu1 %vm8065_vm0, %v8066_v11  ;;  %v8922_v63 = vpack.c.bf16 %v5830_v38, %v5827_v49 }
 0x50c   : > { %7244 = vmatprep.subr.mxu1 %v8066_v11 }
 0x512   : > { %7242 = vmatmul.mubr.f32.vlgmr.msra.gmra.mrb[10].mxu1 %v3570_v53  ;;  %v5809_v53 = vld [vmem:[%s9087_s9 + $0x38] sm:$0xff] }
 0x513   : > { %7245 = vmatpush3.msra.mxu1 %v8828_v10  ;;  %7246 = vmatprep.mubr.msk.f32.mxu1 %vm8065_vm0, %v8066_v11 }
 0x514   : > { %7249 = vmatprep.subr.mxu1 %v8066_v11 }
 0x51a   : > { %7247 = vmatmul.mubr.f32.vlgmr.msra.gmra.mrb[10].mxu1 %v3571_v57  ;;  %v5842_v57 = vand.u32 4294901760, %v5809_v53 }
 0x51b   : > { %7250 = vmatpush3.msra.mxu1 %v3582_v34  ;;  %7251 = vmatprep.mubr.msk.f32.mxu1 %vm8065_vm0, %v8066_v11  ;;  %v5808_v34 = vld [vmem:[%s9087_s9 + $0x30] sm:$0xff] }
 0x51c   : > { %7254 = vmatprep.subr.mxu1 %v8066_v11  ;;  %v5839_v56 = vand.u32 4294901760, %v5808_v34 }
 0x51e   : > { %v8952_v59 = vpack.c.bf16 %v5842_v57, %v5839_v56 }
 0x522   : > { %7252 = vmatmul.mubr.f32.vlgmr.msra.gmra.mrb[10].mxu1 %v3569_v52 }
 0x523   : > { %7255 = vmatpush3.msra.mxu1 %v8828_v10  ;;  %7256 = vmatprep.mubr.msk.f32.mxu1 %vm8065_vm0, %v8066_v11  ;;  %v5802_v10 = vld [vmem:[%s9087_s9] sm:$0xff] }
 0x524   : > { %7289 = vmatprep.subr.mxu1 %v8066_v11  ;;  %v5821_v15 = vand.u32 4294901760, %v5802_v10 }
 0x526   : > { %v8908_v22 = vpack.c.bf16 %v5824_v14, %v5821_v15  ;;  %v8910_v23 = vsub.f32 %v5802_v10, %v5821_v15 }
 0x528   : > { %7711 = vmatpush3.bf16.msra.mxu0 %v8908_v22  ;;  %v5906_v51 = vand.u32 4294901760, %v8910_v23 }
 0x529   : > { %7712 = vmatprep.subr.bf16.mxu0 %v8064_v3 }
 0x52a   : > { %7257 = vmatmul.mubr.f32.vlgmr.msra.gmra.mrb[10].mxu1 %v3569_v52  ;;  %v8932_v52 = vpack.c.bf16 %v5836_v36, %v5833_v43  ;;  %v7758_v44 = vpack.c.bf16 %v5913_v30, %v5906_v51 }
 0x52b   : > { %7290 = vmatpush3.msra.mxu1 %v4421_v60  ;;  %7291 = vmatprep.mubr.msk.f32.mxu1 %vm8065_vm0, %v8066_v11 }
 0x52c   : > { %7294 = vmatprep.subr.mxu1 %v8066_v11  ;;  %7714 = vmatpush3.bf16.msra.mxu0 %v8922_v63 }
 0x52d   : > { %7715 = vmatprep.subr.bf16.mxu0 %v8064_v3 }
 0x52e   : > { %7292 = vmatmul.mubr.f32.vlgmr.msra.gmra.mrb[12].mxu1 %v4490_v5 }
 0x52f   : > { %7295 = vmatpush3.msra.mxu1 %v4501_v6  ;;  %7296 = vmatprep.mubr.msk.f32.mxu1 %vm8065_vm0, %v8066_v11 }
 0x530   : > { %7299 = vmatprep.subr.mxu1 %v8066_v11  ;;  %7717 = vmatpush3.bf16.msra.mxu0 %v8932_v52 }
 0x531   : > { %7718 = vmatprep.subr.bf16.mxu0 %v8064_v3 }
 0x534   : > { %7720 = vmatpush3.bf16.msra.mxu0 %v8952_v59 }
 0x535   : > { %7721 = vmatprep.subr.bf16.mxu0 %v8064_v3 }
 0x536   : > { %7297 = vmatmul.mubr.f32.vlgmr.msra.gmra.mrb[12].mxu1 %v4486_v41 }
 0x537   : > { %7300 = vmatpush3.msra.mxu1 %v4498_v35  ;;  %7301 = vmatprep.mubr.msk.f32.mxu1 %vm8065_vm0, %v8066_v11  ;;  %v5914_v35 = vsub.f32 %v8912_v29, %v5913_v30 }
 0x538   : > { %7304 = vmatprep.subr.mxu1 %v8066_v11 }
 0x539   : > { %v5915_v6 = vand.u32 4294901760, %v5914_v35 }
 0x53e   : > { %7302 = vmatmul.mubr.f32.vlgmr.msra.gmra.mrb[12].mxu1 %v4487_v50  ;;  %v5907_v50 = vsub.f32 %v8910_v23, %v5906_v51 }
 0x53f   : > { %7305 = vmatpush3.msra.mxu1 %v4421_v60  ;;  %7306 = vmatprep.mubr.msk.f32.mxu1 %vm8065_vm0, %v8066_v11 }
 0x540   : > { %7309 = vmatprep.subr.mxu1 %v8066_v11 }
 0x546   : > { %7307 = vmatmul.mubr.f32.vlgmr.msra.gmra.mrb[12].mxu1 %v4488_v61  ;;  %v5908_v61 = vand.u32 4294901760, %v5907_v50 }
 0x547   : > { %7310 = vmatpush3.msra.mxu1 %v4499_v62  ;;  %7311 = vmatprep.mubr.msk.f32.mxu1 %vm8065_vm0, %v8066_v11  ;;  %v5920_v62 = vand.u32 4294901760, %v8943_v42 }
 0x548   : > { %7314 = vmatprep.subr.mxu1 %v8066_v11 }
 0x549   : > { %v7761_v47 = vpack.c.bf16 %v5927_v2, %v5920_v62 }
 0x54e   : > { %7312 = vmatmul.mubr.f32.vlgmr.msra.gmra.mrb[12].mxu1 %v4486_v41 }
 0x54f   : > { %7315 = vmatpush3.msra.mxu1 %v4421_v60  ;;  %7316 = vmatprep.mubr.msk.f32.mxu1 %vm8065_vm0, %v8066_v11  ;;  %v8956_v60 = vsub.f32 %v5809_v53, %v5842_v57 }
 0x550   : > { %7349 = vmatprep.subr.mxu1 %v8066_v11 }
 0x556   : > { %7317 = vmatmul.mubr.f32.vlgmr.msra.gmra.mrb[12].mxu1 %v4486_v41  ;;  %v8954_v41 = vsub.f32 %v5808_v34, %v5839_v56 }
 0x557   : > { %7350 = vmatpush3.msra.mxu1 %v5338_v12  ;;  %7351 = vmatprep.mubr.msk.f32.mxu1 %vm8065_vm0, %v8066_v11 }
 0x558   : > { %7354 = vmatprep.subr.mxu1 %v8066_v11 }
 0x55a   : > { %7352 = vmatmul.mubr.f32.vlgmr.msra.gmra.mrb[14].mxu1 %v5407_v28 }
 0x55b   : > { %7355 = vmatpush3.msra.mxu1 %v5418_v33  ;;  %7356 = vmatprep.mubr.msk.f32.mxu1 %vm8065_vm0, %v8066_v11  ;;  %v5942_v33 = vsub.f32 %v8949_v58, %v5941_v21 }
 0x55c   : > { %7359 = vmatprep.subr.mxu1 %v8066_v11 }
 0x562   : > { %7357 = vmatmul.mubr.f32.vlgmr.msra.gmra.mrb[14].mxu1 %v5403_v9 }
 0x563   : > { %7360 = vmatpush3.msra.mxu1 %v5415_v18  ;;  %7361 = vmatprep.mubr.msk.f32.mxu1 %vm8065_vm0, %v8066_v11 }
 0x564   : > { %7364 = vmatprep.subr.mxu1 %v8066_v11 }
 0x56a   : > { %7362 = vmatmul.mubr.f32.vlgmr.msra.gmra.mrb[14].mxu1 %v5404_v17  ;;  %v7722_v17 = vpack.c.bf16 %v5915_v6, %v5908_v61 }
 0x56b   : > { %7365 = vmatpush3.msra.mxu1 %v5338_v12  ;;  %7366 = vmatprep.mubr.msk.f32.mxu1 %vm8065_vm0, %v8066_v11 }
 0x56c   : > { %7369 = vmatprep.subr.mxu1 %v8066_v11 }
 0x572   : > { %7367 = vmatmul.mubr.f32.vlgmr.msra.gmra.mrb[14].mxu1 %v5405_v19 }
 0x573   : > { %7370 = vmatpush3.msra.mxu1 %v5416_v20  ;;  %7371 = vmatprep.mubr.msk.f32.mxu1 %vm8065_vm0, %v8066_v11  ;;  %v5934_v20 = vand.u32 4294901760, %v8947_v55 }
 0x574   : > { %7374 = vmatprep.subr.mxu1 %v8066_v11 }
 0x575   : > { %v5935_v28 = vsub.f32 %v8947_v55, %v5934_v20 }
 0x57a   : > { %7372 = vmatmul.mubr.f32.vlgmr.msra.gmra.mrb[14].mxu1 %v5403_v9 }
 0x57b   : > { %7375 = vmatpush3.msra.mxu1 %v5338_v12  ;;  %7376 = vmatprep.mubr.msk.f32.mxu1 %vm8065_vm0, %v8066_v11  ;;  %v5928_v12 = vsub.f32 %v8945_v46, %v5927_v2 }
 0x57d   : > { %v5929_v19 = vand.u32 4294901760, %v5928_v12 }
 0x582   : > { %7377 = vmatmul.mubr.f32.vlgmr.msra.gmra.mrb[14].mxu1 %v5403_v9  ;;  %v5921_v9 = vsub.f32 %v8943_v42, %v5920_v62 }
 0x584   : > { %v5922_v18 = vand.u32 4294901760, %v5921_v9 }
 0x585   : > { %v3495_v54 = vpop.xlane.xlu1 %3494 }
 0x586   : > { %7976 = vrcp.f32 %v3495_v54  ;;  %v7725_v24 = vpack.c.bf16 %v5929_v19, %v5922_v18  ;;  %v5936_v54 = vand.u32 4294901760, %v5935_v28 }
 0x587   : > { %7978 = vrcp.f32 %v4413_v39 }
 0x589   : > { %v5330_v48 = vpop.xlane.xlu1 %5329 }
 0x58a   : > { %7980 = vrcp.f32 %v5330_v48  ;;  %v7764_v48 = vpack.c.bf16 %v5941_v21, %v5934_v20 }
 0x58d   : > { %v2581_v38 = vpop.xlane.xlu1 %2580 }
 0x58e   : > { %7982 = vrcp.f32 %v2581_v38 }
 0x590   : > { %v7977_v1 = vpop.eup %7976 }
 0x591   : > { %v7979_v27 = vpop.eup %7978 }
 0x594   : > { %v7981_v4 = vpop.eup %7980 }
 0x598   : > { %v7983_v31 = vpop.eup %7982 }
 0x599   : > { %v3032_v43 = vmul.f32 %v7983_v31, %v8836_v26 }
 0x5fd   : > { %v3945_v16 = vpop.f32.mrb[10].mxu1 }
 0x5fe   : > { %v3950_v25 = vmul.f32 %v7977_v1, %v3945_v16  ;;  %v7258_v0 = vpop.f32.mrb[11].mxu1  ;;  %v5943_v1 = vand.u32 4294901760, %v5942_v33  ;;  %v5948_v16 = vand.u32 4294901760, %v8954_v41 }
 0x600   : > { %5786 = vrot.lane.b32.xlu1 %v3950_v25, %s8070_s12  ;;  %v5955_v25 = vand.u32 4294901760, %v8956_v60  ;;  %v7728_v0 = vpack.c.bf16 %v5943_v1, %v5936_v54  ;;  %v5949_v39 = vsub.f32 %v8954_v41, %v5948_v16  ;;  %s7990_s12 = scalar_lea.vmem %s7989_s24, 256 }
 0x601   : > { %p7992_p2 = scmp.lt.s32.totalorder %s7990_s12, %s7984_s26 }
 0x602   : > { %v5956_v10 = vsub.f32 %v8956_v60, %v5955_v25  ;;  %v5950_v13 = vand.u32 4294901760, %v5949_v39  ;;  %v7767_v49 = vpack.c.bf16 %v5955_v25, %v5948_v16 }
 0x603   : > { %p7993_p3 = por %p7992_p2, %p7991_p1 }
 0x604   : > { %v5957_v15 = vand.u32 4294901760, %v5956_v10 }
 0x605   : > { %p7994_p5 = pnand %p7993_p3, %p7987_p0 }
 0x606   : > { %v7731_v14 = vpack.c.bf16 %v5957_v15, %v5950_v13 }
 0x629   : > { %v4862_v45 = vpop.f32.mrb[12].mxu1 }
 0x62a   : > { %v4867_v32 = vmul.f32 %v7979_v27, %v4862_v45  ;;  %v7318_v40 = vpop.f32.mrb[13].mxu1  ;;  %v7734_v27 = vpack.c.bf16 %v8912_v29, %v8910_v23  ;;  %v7737_v45 = vpack.c.bf16 %v8945_v46, %v8943_v42 }
 0x62b   : > { %v7743_v40 = vpack.c.bf16 %v8956_v60, %v8954_v41 }
 0x62c   : > { %5790 = vrot.lane.b32.xlu0 %v4867_v32, %s8071_s14  ;;  %v7740_v32 = vpack.c.bf16 %v8949_v58, %v8947_v55 }
 0x655   : > { %v5779_v5 = vpop.f32.mrb[14].mxu1 }
 0x656   : > { %v5784_v7 = vmul.f32 %v7981_v4, %v5779_v5  ;;  %v7378_v8 = vpop.f32.mrb[15].mxu1 }
 0x658   : > { %5794 = vrot.lane.b32.xlu1 %v5784_v7, %s8072_s16  ;;  %s6359_s16 = scalar_lea.sflag [#allocation5], %s423_s4 }
 0x672   : > { %v5787_v37 = vpop.permute.xlu1 %5786 }
 0x673   : > { %v5797_v29 = vsel %vm2119_vm2, %v3032_v43, %v5787_v37 }
 0x69e   : > { %v5791_v23 = vpop.permute.xlu0 %5790 }
 0x69f   : > { %v5799_v36 = vsel %vm5798_vm4, %v5797_v29, %v5791_v23 }
 0x6ca   : > { %v5795_v34 = vpop.permute.xlu1 %5794 }
 0x6cb   : > { %v5801_v53 = vsel %vm5800_vm5, %v5799_v36, %v5795_v34 }
 0x6cc   : > { %v5818_v56 = vsel %vm462_vm1, %v5801_v53, 0 }
 0x6cd   : > { %v5893_v57 = vand.u32 4294901760, %v5818_v56 }
 0x6cf   : > { %v5894_v51 = vsub.f32 %v5818_v56, %v5893_v57 }
 0x6d1   : > { %v5895_v30 = vand.u32 4294901760, %v5894_v51 }
 0x6d3   : > { %v5896_v42 = vsub.f32 %v5894_v51, %v5895_v30 }
 0x6d5   : > { %v5897_v46 = vand.u32 4294901760, %v5896_v42 }
 0x6d7   : > { %7396 = vmatmul.mubr.f32.vlgmr.msra.gmra.mrb[8].mxu0 %v5897_v46 }
 0x6d8   : > { %7723 = vmatpush3.bf16.msra.mxu0 %v7722_v17  ;;  %7414 = vmatprep.mubr.msk.f32.mxu0 %vm8065_vm0, %v8066_v11 }
 0x6d9   : > { %7724 = vmatprep.subr.bf16.mxu0 %v8064_v3 }
 0x6dc   : > { %7726 = vmatpush3.bf16.msra.mxu0 %v7725_v24 }
 0x6dd   : > { %7727 = vmatprep.subr.bf16.mxu0 %v8064_v3 }
 0x6e0   : > { %7729 = vmatpush3.bf16.msra.mxu0 %v7728_v0 }
 0x6e1   : > { %7730 = vmatprep.subr.bf16.mxu0 %v8064_v3 }
 0x6e4   : > { %7732 = vmatpush3.bf16.msra.mxu0 %v7731_v14 }
 0x6e5   : > { %7733 = vmatprep.subr.bf16.mxu0 %v8064_v3 }
 0x6e7   : > { %7415 = vmatmul.mubr.f32.vlgmr.msra.gmra.mrb[8].mxu0 %v5893_v57 }
 0x6e8   : > { %7735 = vmatpush3.bf16.msra.mxu0 %v7734_v27  ;;  %7433 = vmatprep.mubr.msk.f32.mxu0 %vm8065_vm0, %v8066_v11 }
 0x6e9   : > { %7736 = vmatprep.subr.bf16.mxu0 %v8064_v3 }
 0x6ec   : > { %7738 = vmatpush3.bf16.msra.mxu0 %v7737_v45 }
 0x6ed   : > { %7739 = vmatprep.subr.bf16.mxu0 %v8064_v3 }
 0x6f0   : > { %7741 = vmatpush3.bf16.msra.mxu0 %v7740_v32 }
 0x6f1   : > { %7742 = vmatprep.subr.bf16.mxu0 %v8064_v3 }
 0x6f4   : > { %7744 = vmatpush3.bf16.msra.mxu0 %v7743_v40 }
 0x6f5   : > { %7745 = vmatprep.subr.bf16.mxu0 %v8064_v3 }
 0x6f7   : > { %7434 = vmatmul.mubr.f32.vlgmr.msra.gmra.mrb[8].mxu0 %v5894_v51 }
 0x6f8   : > { %7747 = vmatpush3.bf16.msra.mxu0 %v8908_v22  ;;  %7452 = vmatprep.mubr.msk.f32.mxu0 %vm8065_vm0, %v8066_v11 }
 0x6f9   : > { %7748 = vmatprep.subr.bf16.mxu0 %v8064_v3 }
 0x6fc   : > { %7750 = vmatpush3.bf16.msra.mxu0 %v8922_v63 }
 0x6fd   : > { %7751 = vmatprep.subr.bf16.mxu0 %v8064_v3 }
 0x700   : > { %7753 = vmatpush3.bf16.msra.mxu0 %v8932_v52 }
 0x701   : > { %7754 = vmatprep.subr.bf16.mxu0 %v8064_v3 }
 0x704   : > { %7756 = vmatpush3.bf16.msra.mxu0 %v8952_v59 }
 0x705   : > { %7757 = vmatprep.subr.bf16.mxu0 %v8064_v3 }
 0x707   : > { %7453 = vmatmul.mubr.f32.vlgmr.msra.gmra.mrb[8].mxu0 %v5895_v30 }
 0x708   : > { %7759 = vmatpush3.bf16.msra.mxu0 %v7758_v44  ;;  %7471 = vmatprep.mubr.msk.f32.mxu0 %vm8065_vm0, %v8066_v11 }
 0x709   : > { %7760 = vmatprep.subr.bf16.mxu0 %v8064_v3 }
 0x70c   : > { %7762 = vmatpush3.bf16.msra.mxu0 %v7761_v47 }
 0x70d   : > { %7763 = vmatprep.subr.bf16.mxu0 %v8064_v3 }
 0x710   : > { %7765 = vmatpush3.bf16.msra.mxu0 %v7764_v48 }
 0x711   : > { %7766 = vmatprep.subr.bf16.mxu0 %v8064_v3 }
 0x714   : > { %7768 = vmatpush3.bf16.msra.mxu0 %v7767_v49 }
 0x715   : > { %7769 = vmatprep.subr.bf16.mxu0 %v8064_v3 }
 0x717   : > { %7472 = vmatmul.mubr.f32.vlgmr.msra.gmra.mrb[8].mxu0 %v5893_v57 }
 0x718   : > { %7771 = vmatpush3.bf16.msra.mxu0 %v8908_v22  ;;  %7490 = vmatprep.mubr.msk.f32.mxu0 %vm8065_vm0, %v8066_v11  ;;  %v6480_v11 = vld [vmem:[%s9088_s10] ss:$0 sm:$0xff] }
 0x719   : > { %7772 = vmatprep.subr.bf16.mxu0 %v8064_v3 }
 0x71c   : > { %7774 = vmatpush3.bf16.msra.mxu0 %v8922_v63 }
 0x71d   : > { %7775 = vmatprep.subr.bf16.mxu0 %v8064_v3 }
 0x720   : > { %7777 = vmatpush3.bf16.msra.mxu0 %v8932_v52 }
 0x721   : > { %7778 = vmatprep.subr.bf16.mxu0 %v8064_v3 }
 0x724   : > { %7780 = vmatpush3.bf16.msra.mxu0 %v8952_v59 }
 0x727   : > { %7491 = vmatmul.mubr.f32.vlgmr.msra.gmra.mrb[8].mxu0 %v5893_v57 }
 0x7fa   : > { %v6353_v26 = vpop.f32.mrb[8].mxu0 }
 0x7fb   : > { %v7785_v22 = vadd.f32 %v6480_v11, %v6353_v26  ;;  %v7492_v63 = vpop.f32.mrb[9].mxu0 }
 0x7fd   : > { %6357 = vst.msk [vmem:[%s425_s1] sm:$0xff] %vm462_vm1, %v7785_v22 }
 0x7fe   : > { %7997 = shalt.err (!%p7994_p5)
}
 0x7ff   : > { %s7998_s4 = scalar_lea.hbm %s9030_s15, 128  ;;  %s8002_s23 = scalar_lea.hbm %s9089_s11, 256 }
 0x800   : > { %p7999_p6 = scmp.ne.s32.totalorder %s9030_s15, %s7998_s4  ;;  %p8003_p10 = scmp.lt.u32.totalorder %s9030_s15, %s9089_s11 }
 0x801   : > { %p8004_p11 = scmp.lt.u32.totalorder %s8002_s23, %s7998_s4  ;;  %p8006_p13 = scmp.lt.u32.totalorder %s7998_s4, %s9030_s15 }
 0x802   : > { %p8000_p7 = pnand %p7999_p6, %p8174_p4 }
 0x803   : > { %p8005_p12 = por %p8004_p11, %p8003_p10 }
 0x804   : > { %p8001_p9 = pneg %p8000_p7 }
 0x805   : > { %p8007_p0 = por %p8006_p13, %p8005_p12 }
 0x807   : > { %p8008_p1 = pnand %p8007_p0, %p8001_p9 }
 0x809   : > { %8011 = shalt.err (!%p8008_p1)
}
 0x80a   : > { %7904 = dma.vmem_to_hbm [thread:$0]  (%p8174_p4), %s9032_s28, 128, %s9030_s15, %s6359_s16  }
 0x80b PF: > { %p7910_p2 = scmp.ge.s32.totalorder %s8062_s22, 2  ;;  %s6385_s26 = sand.u32 1, %s8042_s17  }
 0x80c   : > { %s6386_s24 = scalar_lea.sflag [#allocation5], %s6385_s26 }
 0x80d   : > { %p7907_p3 = pnand %p7910_p2, %p8181_p8 }
 0x80f   : > { %8037 = dma.done.wait (!%p7907_p3), %s6386_s24, 128  }
 0x810   : > { %8039 = vsyncadd (!%p7907_p3), %s6386_s24, 4294967168  ;;  %s24_s22 = sadd.s32 1, %s8062_s22   ;;  %s9102_s17 = smov %s8046_s18 }
 0x811   : > { %p21_p5 = scmp.ge.s32.totalorder %s24_s22, 4   ;;  %s9103_s18 = smov %s8050_s19 }
 0x812   : > { %s9104_s19 = smov %s8187_s30  ;;  %s9105_s20 = smov %s8058_s21 }
 0x813   : > { %s9106_s21 = smov %s9108_s25  ;;  %23 = sbr.rel (!%p21_p5) target bundleno = 7 (0x7), region = 109 }
 0x81a   :  { %6391 = vsyncpa [#allocation5], 1 }
 0x81b   :  { %6393 = vsyncpa [#allocation5 + $0x1], 1 }

</bundles_post_ra>
